<compile_context>
chip_gen: v7x
topology: tpu7x:2x2x1
jax: 0.10.0
libtpu: 0.0.40
codegen_flags: <defaults>
</compile_context>

<pallas_src>
import functools

import jax
import jax.numpy as jnp
from jax.experimental import pallas as pl
from jax.experimental.pallas import tpu as pltpu

# Original (PyTorch) dims.
IN_DIM = 28 * 28          # 784 (kept unpadded; full-array last block dim)
H1, H2 = 500, 250
HIDDEN = 32               # "hidden" constructor arg

# Lane-padded internal dims (weights are zero-padded, so results are exact).
H1_PAD = 512
H2_PAD = 256
HID_PAD = 128             # lane-dense latent so the h store is unmasked


def _dsae_kernel(x_ref, orig_ref,
                 w1_ref, b1_ref, w2_ref, b2_ref, w3_ref, b3_ref,
                 w4_ref, b4_ref, w5_ref, b5_ref, w6_ref, b6_ref,
                 loss_ref, recon_ref, h_ref):
    x = x_ref[...]                                 # caller dtype (bf16 or f32)
    orig = orig_ref[...].astype(jnp.float32)       # f32 in-register for exact SSE

    def dense(a, w_ref, b_ref):
        # bf16 x bf16 on the MXU, f32 accumulation, f32 bias add.
        return jnp.dot(a.astype(jnp.bfloat16), w_ref[...],
                       preferred_element_type=jnp.float32) + b_ref[...]

    # ----- encoder (Dropout -> identity, activation = Identity) -----
    a1 = dense(x, w1_ref, b1_ref)
    a2 = dense(a1, w2_ref, b2_ref)
    h = dense(a2, w3_ref, b3_ref)                  # (tb, 128), cols 32.. are 0

    # ----- decoder -----
    d1 = dense(h, w4_ref, b4_ref)
    d2 = dense(d1, w5_ref, b5_ref)
    out = dense(d2, w6_ref, b6_ref)                # (tb, 784) f32

    # ----- per-tile partial SSE for F.mse_loss (no padded columns exist) -----
    diff = orig - out
    partial = jnp.sum(diff * diff)
    loss_ref[...] = jnp.full(loss_ref.shape, partial, dtype=jnp.float32)

    recon_ref[...] = out.astype(recon_ref.dtype)   # bf16 writeback
    h_ref[...] = h


def _pick_tile(b):
    """Largest lane/sublane-friendly tile that divides the batch.

    Capped at 1024 (v7x VMEM budget); for B >= 256 also capped at B // 2 so
    the grid has at least two steps and v7x's two TensorCores both get work.
    """
    cap = 1024
    if b >= 256:
        cap = min(cap, b // 2)
    for tb in (1024, 512, 256, 128, 64, 32, 16, 8):
        if tb <= cap and b % tb == 0:
            return tb
    return b


def _pad2d(a, rows, cols):
    r, c = a.shape
    return jnp.pad(a, ((0, rows - r), (0, cols - c)))


def prepare_params(params):
    """Zero-pad internal dims to lane-dense sizes; weights -> bf16, biases f32."""
    (w1, b1, w2, b2, w3, b3, w4, b4, w5, b5, w6, b6) = params
    pads = [(IN_DIM, H1_PAD), (H1_PAD, H2_PAD), (H2_PAD, HID_PAD),
            (HID_PAD, H2_PAD), (H2_PAD, H1_PAD), (H1_PAD, IN_DIM)]
    ws = [w1, w2, w3, w4, w5, w6]
    bs = [b1, b2, b3, b4, b5, b6]
    out = []
    for (rp, cp), w, b in zip(pads, ws, bs):
        out.append(_pad2d(w.astype(jnp.float32), rp, cp).astype(jnp.bfloat16))
        out.append(_pad2d(b.astype(jnp.float32), 1, cp))
    return tuple(out)


def dsae_forward(inputs, original, params):
    """inputs/original: (B, 1, 28, 28).  Returns (loss, recon[bf16], h)."""
    B = inputs.shape[0]
    x = inputs.reshape(B, IN_DIM)        # free contiguous reshape, keep dtype
    orig = original.reshape(B, IN_DIM)   # free contiguous reshape

    p = prepare_params(params)

    tb = _pick_tile(B)
    num_tiles = B // tb

    const0 = lambda i: (0, 0)
    row_spec = lambda cols: pl.BlockSpec((tb, cols), lambda i: (i, 0))

    in_specs = [row_spec(IN_DIM), row_spec(IN_DIM)]
    in_specs += [pl.BlockSpec(arr.shape, const0) for arr in p]

    flops = 2 * B * (IN_DIM * H1_PAD + H1_PAD * H2_PAD + H2_PAD * HID_PAD
                     + HID_PAD * H2_PAD + H2_PAD * H1_PAD + H1_PAD * IN_DIM)
    itemsize = lambda a: jnp.dtype(a.dtype).itemsize
    bytes_accessed = (sum(int(a.size) * itemsize(a) for a in p)        # weights, once
                      + x.size * itemsize(x) + orig.size * itemsize(orig)
                      + B * IN_DIM * 2 + B * HID_PAD * 4               # recon bf16, h f32
                      + num_tiles * 128 * 4)                           # loss partials

    loss_partials, recon, h_full = pl.pallas_call(
        _dsae_kernel,
        grid=(num_tiles,),
        out_shape=(
            jax.ShapeDtypeStruct((num_tiles, 1, 128), jnp.float32),    # per-tile SSE
            jax.ShapeDtypeStruct((B, IN_DIM), jnp.bfloat16),           # reconstruction
            jax.ShapeDtypeStruct((B, HID_PAD), jnp.float32),           # latent (padded)
        ),
        in_specs=in_specs,
        out_specs=(
            pl.BlockSpec((1, 1, 128), lambda i: (i, 0, 0)),
            row_spec(IN_DIM),
            pl.BlockSpec((tb, HID_PAD), lambda i: (i, 0)),
        ),
        compiler_params=pltpu.CompilerParams(
            dimension_semantics=("parallel",),
            # 48 MiB: lifts v5e's 16 MiB scoped default, stays under v7x's
            # 64 MiB physical VMEM, and comfortably covers the ~30 MB
            # double-buffered working set at TB=1024 (trivial on v6e).
            vmem_limit_bytes=48 * 1024 * 1024,
        ),
        cost_estimate=pl.CostEstimate(
            flops=flops, transcendentals=0, bytes_accessed=int(bytes_accessed)),
    )(x, orig, *p)

    # F.mse_loss mean uses the un-padded element count.
    loss = jnp.sum(loss_partials[:, 0, 0]) / jnp.float32(B * IN_DIM)
    recon = recon.reshape(B, 1, 28, 28)          # free contiguous reshape (bf16)
    h = h_full[:, :HIDDEN]                       # tiny slice of the lane-padded latent
    return loss, recon, h


def init_params(key):
    """Deterministic parameter init mirroring the nn.Linear shapes.

    Weights are stored (in_features, out_features) for the x @ W convention
    (equivalent to PyTorch's x @ W.T with W of shape (out, in)).
    """
    dims = [(IN_DIM, H1), (H1, H2), (H2, HIDDEN),
            (HIDDEN, H2), (H2, H1), (H1, IN_DIM)]
    params = []
    keys = jax.random.split(key, len(dims))
    for k, (din, dout) in zip(keys, dims):
        bound = 1.0 / jnp.sqrt(din)  # PyTorch default uniform bound
        kw, kb = jax.random.split(k)
        w = jax.random.uniform(kw, (din, dout), jnp.float32, -bound, bound)
        b = jax.random.uniform(kb, (1, dout), jnp.float32, -bound, bound)
        params += [w, b]
    return tuple(params)


def _reference(inputs, original, params):
    """Pure-JAX f32 reference of the PyTorch forward (Dropout = identity)."""
    B = inputs.shape[0]
    x = inputs.reshape(B, IN_DIM).astype(jnp.float32)
    o = original.reshape(B, IN_DIM).astype(jnp.float32)
    w1, b1, w2, b2, w3, b3, w4, b4, w5, b5, w6, b6 = params
    h = ((x @ w1 + b1) @ w2 + b2) @ w3 + b3
    out = ((h @ w4 + b4) @ w5 + b5) @ w6 + b6
    loss = jnp.mean((o - out) ** 2)
    return loss, out.reshape(B, 1, 28, 28), h


if __name__ == "__main__":
    key = jax.random.PRNGKey(0)
    k_params, k_in, k_noise = jax.random.split(key, 3)

    params = init_params(k_params)

    B = 24  # 3 grid steps at tb=8: exercises the tiled per-tile loss reduction
    original = jax.random.uniform(k_in, (B, 1, 28, 28), jnp.float32)
    noise = 0.1 * jax.random.normal(k_noise, (B, 1, 28, 28), jnp.float32)
    # bf16 noisy input: the cast fuses into its producer, so the kernel streams
    # half the bytes for x.  f32 inputs work identically (cast happens in-kernel).
    noisy = (original + noise).astype(jnp.bfloat16)

    fwd = jax.jit(functools.partial(dsae_forward, params=params))
    loss, recon, h = fwd(noisy, original)
    jax.block_until_ready((loss, recon, h))

    # Shape / finiteness sanity (matches the PyTorch module's forward/reconstruct).
    assert loss.shape == ()
    assert recon.shape == (B, 1, 28, 28)
    assert h.shape == (B, HIDDEN)
    assert bool(jnp.isfinite(loss))

    # Numerical sanity vs. a pure-JAX f32 reference (bf16 weights/recon -> loose tol).
    ref_loss, ref_recon, ref_h = _reference(noisy, original, params)
    assert bool(jnp.allclose(loss, ref_loss, rtol=5e-2, atol=1e-3))
    assert float(jnp.max(jnp.abs(h - ref_h))) < 5e-2
    assert float(jnp.max(jnp.abs(recon.astype(jnp.float32) - ref_recon))) < 5e-2

    print("KERNEL_OK")
</pallas_src>

<mosaic_0001>
module attributes {stable_mosaic.version = 11 : i64} {
  func.func @_dsae_kernel(%arg0: i32, %arg1: memref<8x784xbf16, #tpu.memory_space<vmem>>, %arg2: memref<8x784xf32, #tpu.memory_space<vmem>>, %arg3: memref<784x512xbf16, #tpu.memory_space<vmem>>, %arg4: memref<1x512xf32, #tpu.memory_space<vmem>>, %arg5: memref<512x256xbf16, #tpu.memory_space<vmem>>, %arg6: memref<1x256xf32, #tpu.memory_space<vmem>>, %arg7: memref<256x128xbf16, #tpu.memory_space<vmem>>, %arg8: memref<1x128xf32, #tpu.memory_space<vmem>>, %arg9: memref<128x256xbf16, #tpu.memory_space<vmem>>, %arg10: memref<1x256xf32, #tpu.memory_space<vmem>>, %arg11: memref<256x512xbf16, #tpu.memory_space<vmem>>, %arg12: memref<1x512xf32, #tpu.memory_space<vmem>>, %arg13: memref<512x784xbf16, #tpu.memory_space<vmem>>, %arg14: memref<1x784xf32, #tpu.memory_space<vmem>>, %arg15: memref<1x1x128xf32, #tpu.memory_space<vmem>>, %arg16: memref<8x784xbf16, #tpu.memory_space<vmem>>, %arg17: memref<8x128xf32, #tpu.memory_space<vmem>>) attributes {dimension_semantics = [#tpu.dimension_semantics<parallel>], iteration_bounds = array<i64: 3>, scalar_prefetch = 0 : i64, scratch_operands = 0 : i64, tpu.core_type = #tpu.core_type<tc>, window_params = [{transform_indices = @transform_0, window_bounds = array<i64: 8, 784>}, {transform_indices = @transform_1, window_bounds = array<i64: 8, 784>}, {pipeline_mode = #tpu.pipeline_mode<synchronous>, transform_indices = @transform_2, window_bounds = array<i64: 784, 512>}, {pipeline_mode = #tpu.pipeline_mode<synchronous>, transform_indices = @transform_3, window_bounds = array<i64: 1, 512>}, {pipeline_mode = #tpu.pipeline_mode<synchronous>, transform_indices = @transform_4, window_bounds = array<i64: 512, 256>}, {pipeline_mode = #tpu.pipeline_mode<synchronous>, transform_indices = @transform_5, window_bounds = array<i64: 1, 256>}, {pipeline_mode = #tpu.pipeline_mode<synchronous>, transform_indices = @transform_6, window_bounds = array<i64: 256, 128>}, {pipeline_mode = #tpu.pipeline_mode<synchronous>, transform_indices = @transform_7, window_bounds = array<i64: 1, 128>}, {pipeline_mode = #tpu.pipeline_mode<synchronous>, transform_indices = @transform_8, window_bounds = array<i64: 128, 256>}, {pipeline_mode = #tpu.pipeline_mode<synchronous>, transform_indices = @transform_9, window_bounds = array<i64: 1, 256>}, {pipeline_mode = #tpu.pipeline_mode<synchronous>, transform_indices = @transform_10, window_bounds = array<i64: 256, 512>}, {pipeline_mode = #tpu.pipeline_mode<synchronous>, transform_indices = @transform_11, window_bounds = array<i64: 1, 512>}, {pipeline_mode = #tpu.pipeline_mode<synchronous>, transform_indices = @transform_12, window_bounds = array<i64: 512, 784>}, {pipeline_mode = #tpu.pipeline_mode<synchronous>, transform_indices = @transform_13, window_bounds = array<i64: 1, 784>}, {transform_indices = @transform_14, window_bounds = array<i64: 1, 1, 128>}, {transform_indices = @transform_15, window_bounds = array<i64: 8, 784>}, {transform_indices = @transform_16, window_bounds = array<i64: 8, 128>}]} {
    %c0 = arith.constant 0 : index
    %c0_0 = arith.constant 0 : index
    %0 = vector.load %arg1[%c0, %c0_0] : memref<8x784xbf16, #tpu.memory_space<vmem>>, vector<8x784xbf16>
    %c0_1 = arith.constant 0 : index
    %c0_2 = arith.constant 0 : index
    %1 = vector.load %arg2[%c0_1, %c0_2] : memref<8x784xf32, #tpu.memory_space<vmem>>, vector<8x784xf32>
    %c0_3 = arith.constant 0 : index
    %c0_4 = arith.constant 0 : index
    %2 = vector.load %arg3[%c0_3, %c0_4] : memref<784x512xbf16, #tpu.memory_space<vmem>>, vector<784x512xbf16>
    %cst = arith.constant dense<0.000000e+00> : vector<8x512xf32>
    %3 = tpu.matmul %0, %2, %cst {dimension_numbers = #tpu.dot_dimension_numbers<[1], [0], [0], [1], [0, 0, 1, 1], [], []>} : vector<8x784xbf16>, vector<784x512xbf16>, vector<8x512xf32> -> vector<8x512xf32>
    %c0_5 = arith.constant 0 : index
    %c0_6 = arith.constant 0 : index
    %4 = vector.load %arg4[%c0_5, %c0_6] : memref<1x512xf32, #tpu.memory_space<vmem>>, vector<1x512xf32>
    %5 = vector.broadcast %4 : vector<1x512xf32> to vector<8x512xf32>
    %6 = arith.addf %3, %5 : vector<8x512xf32>
    %7 = arith.truncf %6 : vector<8x512xf32> to vector<8x512xbf16>
    %c0_7 = arith.constant 0 : index
    %c0_8 = arith.constant 0 : index
    %8 = vector.load %arg5[%c0_7, %c0_8] : memref<512x256xbf16, #tpu.memory_space<vmem>>, vector<512x256xbf16>
    %cst_9 = arith.constant dense<0.000000e+00> : vector<8x256xf32>
    %9 = tpu.matmul %7, %8, %cst_9 {dimension_numbers = #tpu.dot_dimension_numbers<[1], [0], [0], [1], [0, 0, 1, 1], [], []>} : vector<8x512xbf16>, vector<512x256xbf16>, vector<8x256xf32> -> vector<8x256xf32>
    %c0_10 = arith.constant 0 : index
    %c0_11 = arith.constant 0 : index
    %10 = vector.load %arg6[%c0_10, %c0_11] : memref<1x256xf32, #tpu.memory_space<vmem>>, vector<1x256xf32>
    %11 = vector.broadcast %10 : vector<1x256xf32> to vector<8x256xf32>
    %12 = arith.addf %9, %11 : vector<8x256xf32>
    %13 = arith.truncf %12 : vector<8x256xf32> to vector<8x256xbf16>
    %c0_12 = arith.constant 0 : index
    %c0_13 = arith.constant 0 : index
    %14 = vector.load %arg7[%c0_12, %c0_13] : memref<256x128xbf16, #tpu.memory_space<vmem>>, vector<256x128xbf16>
    %cst_14 = arith.constant dense<0.000000e+00> : vector<8x128xf32>
    %15 = tpu.matmul %13, %14, %cst_14 {dimension_numbers = #tpu.dot_dimension_numbers<[1], [0], [0], [1], [0, 0, 1, 1], [], []>} : vector<8x256xbf16>, vector<256x128xbf16>, vector<8x128xf32> -> vector<8x128xf32>
    %c0_15 = arith.constant 0 : index
    %c0_16 = arith.constant 0 : index
    %16 = vector.load %arg8[%c0_15, %c0_16] : memref<1x128xf32, #tpu.memory_space<vmem>>, vector<1x128xf32>
    %17 = vector.broadcast %16 : vector<1x128xf32> to vector<8x128xf32>
    %18 = arith.addf %15, %17 : vector<8x128xf32>
    %19 = arith.truncf %18 : vector<8x128xf32> to vector<8x128xbf16>
    %c0_17 = arith.constant 0 : index
    %c0_18 = arith.constant 0 : index
    %20 = vector.load %arg9[%c0_17, %c0_18] : memref<128x256xbf16, #tpu.memory_space<vmem>>, vector<128x256xbf16>
    %cst_19 = arith.constant dense<0.000000e+00> : vector<8x256xf32>
    %21 = tpu.matmul %19, %20, %cst_19 {dimension_numbers = #tpu.dot_dimension_numbers<[1], [0], [0], [1], [0, 0, 1, 1], [], []>} : vector<8x128xbf16>, vector<128x256xbf16>, vector<8x256xf32> -> vector<8x256xf32>
    %c0_20 = arith.constant 0 : index
    %c0_21 = arith.constant 0 : index
    %22 = vector.load %arg10[%c0_20, %c0_21] : memref<1x256xf32, #tpu.memory_space<vmem>>, vector<1x256xf32>
    %23 = vector.broadcast %22 : vector<1x256xf32> to vector<8x256xf32>
    %24 = arith.addf %21, %23 : vector<8x256xf32>
    %25 = arith.truncf %24 : vector<8x256xf32> to vector<8x256xbf16>
    %c0_22 = arith.constant 0 : index
    %c0_23 = arith.constant 0 : index
    %26 = vector.load %arg11[%c0_22, %c0_23] : memref<256x512xbf16, #tpu.memory_space<vmem>>, vector<256x512xbf16>
    %cst_24 = arith.constant dense<0.000000e+00> : vector<8x512xf32>
    %27 = tpu.matmul %25, %26, %cst_24 {dimension_numbers = #tpu.dot_dimension_numbers<[1], [0], [0], [1], [0, 0, 1, 1], [], []>} : vector<8x256xbf16>, vector<256x512xbf16>, vector<8x512xf32> -> vector<8x512xf32>
    %c0_25 = arith.constant 0 : index
    %c0_26 = arith.constant 0 : index
    %28 = vector.load %arg12[%c0_25, %c0_26] : memref<1x512xf32, #tpu.memory_space<vmem>>, vector<1x512xf32>
    %29 = vector.broadcast %28 : vector<1x512xf32> to vector<8x512xf32>
    %30 = arith.addf %27, %29 : vector<8x512xf32>
    %31 = arith.truncf %30 : vector<8x512xf32> to vector<8x512xbf16>
    %c0_27 = arith.constant 0 : index
    %c0_28 = arith.constant 0 : index
    %32 = vector.load %arg13[%c0_27, %c0_28] : memref<512x784xbf16, #tpu.memory_space<vmem>>, vector<512x784xbf16>
    %cst_29 = arith.constant dense<0.000000e+00> : vector<8x784xf32>
    %33 = tpu.matmul %31, %32, %cst_29 {dimension_numbers = #tpu.dot_dimension_numbers<[1], [0], [0], [1], [0, 0, 1, 1], [], []>} : vector<8x512xbf16>, vector<512x784xbf16>, vector<8x784xf32> -> vector<8x784xf32>
    %c0_30 = arith.constant 0 : index
    %c0_31 = arith.constant 0 : index
    %34 = vector.load %arg14[%c0_30, %c0_31] : memref<1x784xf32, #tpu.memory_space<vmem>>, vector<1x784xf32>
    %35 = vector.broadcast %34 : vector<1x784xf32> to vector<8x784xf32>
    %36 = arith.addf %33, %35 : vector<8x784xf32>
    %37 = arith.subf %1, %36 : vector<8x784xf32>
    %38 = arith.mulf %37, %37 : vector<8x784xf32>
    %39 = vector.shape_cast %38 : vector<8x784xf32> to vector<1x8x784xf32>
    %cst_32 = arith.constant dense<0.000000e+00> : vector<1xf32>
    %40 = vector.multi_reduction <add>, %39, %cst_32 [1, 2] : vector<1x8x784xf32> to vector<1xf32>
    %41 = vector.shape_cast %40 : vector<1xf32> to vector<1x1x1xf32>
    %42 = vector.extract %41[0, 0, 0] : f32 from vector<1x1x1xf32>
    %43 = vector.broadcast %42 : f32 to vector<1x1x128xf32>
    %c0_33 = arith.constant 0 : index
    %c0_34 = arith.constant 0 : index
    %c0_35 = arith.constant 0 : index
    %44 = vector.load %arg15[%c0_33, %c0_34, %c0_35] : memref<1x1x128xf32, #tpu.memory_space<vmem>>, vector<1x1x128xf32>
    tpu.vector_store %arg15[%c0_33, %c0_34, %c0_35], %43 {strides = array<i32>} : memref<1x1x128xf32, #tpu.memory_space<vmem>>, vector<1x1x128xf32>,
    %45 = arith.truncf %36 : vector<8x784xf32> to vector<8x784xbf16>
    %c0_36 = arith.constant 0 : index
    %c0_37 = arith.constant 0 : index
    %46 = vector.load %arg16[%c0_36, %c0_37] : memref<8x784xbf16, #tpu.memory_space<vmem>>, vector<8x784xbf16>
    tpu.vector_store %arg16[%c0_36, %c0_37], %45 {strides = array<i32>} : memref<8x784xbf16, #tpu.memory_space<vmem>>, vector<8x784xbf16>,
    %c0_38 = arith.constant 0 : index
    %c0_39 = arith.constant 0 : index
    %47 = vector.load %arg17[%c0_38, %c0_39] : memref<8x128xf32, #tpu.memory_space<vmem>>, vector<8x128xf32>
    tpu.vector_store %arg17[%c0_38, %c0_39], %18 {strides = array<i32>} : memref<8x128xf32, #tpu.memory_space<vmem>>, vector<8x128xf32>,
    return
  }
  func.func @transform_0(%arg0: i32) -> (i32, i32) {
    %c0_i32 = arith.constant 0 : i32
    %c0_i32_0 = arith.constant 0 : i32
    return %arg0, %c0_i32 : i32, i32
  }
  func.func @transform_1(%arg0: i32) -> (i32, i32) {
    %c0_i32 = arith.constant 0 : i32
    %c0_i32_0 = arith.constant 0 : i32
    return %arg0, %c0_i32 : i32, i32
  }
  func.func @transform_2(%arg0: i32) -> (i32, i32) {
    %c0_i32 = arith.constant 0 : i32
    %c0_i32_0 = arith.constant 0 : i32
    %c0_i32_1 = arith.constant 0 : i32
    return %c0_i32, %c0_i32_0 : i32, i32
  }
  func.func @transform_3(%arg0: i32) -> (i32, i32) {
    %c0_i32 = arith.constant 0 : i32
    %c0_i32_0 = arith.constant 0 : i32
    %c0_i32_1 = arith.constant 0 : i32
    return %c0_i32, %c0_i32_0 : i32, i32
  }
  func.func @transform_4(%arg0: i32) -> (i32, i32) {
    %c0_i32 = arith.constant 0 : i32
    %c0_i32_0 = arith.constant 0 : i32
    %c0_i32_1 = arith.constant 0 : i32
    return %c0_i32, %c0_i32_0 : i32, i32
  }
  func.func @transform_5(%arg0: i32) -> (i32, i32) {
    %c0_i32 = arith.constant 0 : i32
    %c0_i32_0 = arith.constant 0 : i32
    %c0_i32_1 = arith.constant 0 : i32
    return %c0_i32, %c0_i32_0 : i32, i32
  }
  func.func @transform_6(%arg0: i32) -> (i32, i32) {
    %c0_i32 = arith.constant 0 : i32
    %c0_i32_0 = arith.constant 0 : i32
    %c0_i32_1 = arith.constant 0 : i32
    return %c0_i32, %c0_i32_0 : i32, i32
  }
  func.func @transform_7(%arg0: i32) -> (i32, i32) {
    %c0_i32 = arith.constant 0 : i32
    %c0_i32_0 = arith.constant 0 : i32
    %c0_i32_1 = arith.constant 0 : i32
    return %c0_i32, %c0_i32_0 : i32, i32
  }
  func.func @transform_8(%arg0: i32) -> (i32, i32) {
    %c0_i32 = arith.constant 0 : i32
    %c0_i32_0 = arith.constant 0 : i32
    %c0_i32_1 = arith.constant 0 : i32
    return %c0_i32, %c0_i32_0 : i32, i32
  }
  func.func @transform_9(%arg0: i32) -> (i32, i32) {
    %c0_i32 = arith.constant 0 : i32
    %c0_i32_0 = arith.constant 0 : i32
    %c0_i32_1 = arith.constant 0 : i32
    return %c0_i32, %c0_i32_0 : i32, i32
  }
  func.func @transform_10(%arg0: i32) -> (i32, i32) {
    %c0_i32 = arith.constant 0 : i32
    %c0_i32_0 = arith.constant 0 : i32
    %c0_i32_1 = arith.constant 0 : i32
    return %c0_i32, %c0_i32_0 : i32, i32
  }
  func.func @transform_11(%arg0: i32) -> (i32, i32) {
    %c0_i32 = arith.constant 0 : i32
    %c0_i32_0 = arith.constant 0 : i32
    %c0_i32_1 = arith.constant 0 : i32
    return %c0_i32, %c0_i32_0 : i32, i32
  }
  func.func @transform_12(%arg0: i32) -> (i32, i32) {
    %c0_i32 = arith.constant 0 : i32
    %c0_i32_0 = arith.constant 0 : i32
    %c0_i32_1 = arith.constant 0 : i32
    return %c0_i32, %c0_i32_0 : i32, i32
  }
  func.func @transform_13(%arg0: i32) -> (i32, i32) {
    %c0_i32 = arith.constant 0 : i32
    %c0_i32_0 = arith.constant 0 : i32
    %c0_i32_1 = arith.constant 0 : i32
    return %c0_i32, %c0_i32_0 : i32, i32
  }
  func.func @transform_14(%arg0: i32) -> (i32, i32, i32) {
    %c0_i32 = arith.constant 0 : i32
    %c0_i32_0 = arith.constant 0 : i32
    %c0_i32_1 = arith.constant 0 : i32
    return %arg0, %c0_i32, %c0_i32_0 : i32, i32, i32
  }
  func.func @transform_15(%arg0: i32) -> (i32, i32) {
    %c0_i32 = arith.constant 0 : i32
    %c0_i32_0 = arith.constant 0 : i32
    return %arg0, %c0_i32 : i32, i32
  }
  func.func @transform_16(%arg0: i32) -> (i32, i32) {
    %c0_i32 = arith.constant 0 : i32
    %c0_i32_0 = arith.constant 0 : i32
    return %arg0, %c0_i32 : i32, i32
  }
}

</mosaic_0001>

<bundles_post_ra>
// kernel: dsae_forward.1
= control target key start
LH: loop header
LB: loop body
LE: loop exit
PB: predicated region body
PF: predicated region fallthrough
CT: control target
= control target key end

     0   :  { %s9182_s0 = inlined_call_operand.vmem [shape: bf16[24,784], index: 0, kind: input, shape index: {}]   ;;  %s9183_s1 = inlined_call_operand.vmem [shape: f32[24,784], index: 1, kind: input, shape index: {}]   ;;  %s9184_s2 = inlined_call_operand.vmem [shape: bf16[784,512], index: 2, kind: input, shape index: {}]   ;;  %s9185_s3 = inlined_call_operand.vmem [shape: f32[1,512], index: 3, kind: input, shape index: {}]   ;;  %s9186_s4 = inlined_call_operand.vmem [shape: bf16[512,256], index: 4, kind: input, shape index: {}]   ;;  %s9187_s5 = inlined_call_operand.vmem [shape: f32[1,256], index: 5, kind: input, shape index: {}]   ;;  %s9188_s6 = inlined_call_operand.vmem [shape: bf16[256,128], index: 6, kind: input, shape index: {}]   ;;  %s9189_s7 = inlined_call_operand.vmem [shape: f32[1,128], index: 7, kind: input, shape index: {}]   ;;  %s9190_s8 = inlined_call_operand.vmem [shape: bf16[128,256], index: 8, kind: input, shape index: {}]   ;;  %s9191_s9 = inlined_call_operand.vmem [shape: f32[1,256], index: 9, kind: input, shape index: {}]   ;;  %s9192_s10 = inlined_call_operand.vmem [shape: bf16[256,512], index: 10, kind: input, shape index: {}]   ;;  %s9193_s11 = inlined_call_operand.vmem [shape: f32[1,512], index: 11, kind: input, shape index: {}]   ;;  %s9194_s12 = inlined_call_operand.vmem [shape: bf16[512,784], index: 12, kind: input, shape index: {}]   ;;  %s9195_s13 = inlined_call_operand.vmem [shape: f32[1,784], index: 13, kind: input, shape index: {}]   ;;  %s9196_s14 = inlined_call_operand.vmem [shape: f32[3,1,128], index: 14, kind: output, shape index: {0}]   ;;  %s9197_s15 = inlined_call_operand.vmem [shape: bf16[24,784], index: 15, kind: output, shape index: {1}]   ;;  %s9198_s16 = inlined_call_operand.hbm [shape: f32[24,128], index: 16, kind: output, shape index: {2}]  }
   0x1   :  { %9206 = sst [smem:[#allocation11_spill]] %s9182_s0 }
   0x2   :  { %9207 = sst [smem:[#allocation12_spill]] %s9183_s1 }
   0x3   :  { %9208 = sst [smem:[#allocation13_spill]] %s9196_s14 }
   0x4   :  { %22 = vsyncpa [#allocation3], 0 }
   0x5   :  { %24 = vsyncpa [#allocation3 + $0x1], 0  ;;  %s7187_s21 = smov 0   ;;  %s7189_s22 = smov 0  }
   0x6   :  { %s7191_s23 = smov 0   ;;  %s7193_s24 = smov 0  }
   0x7 LB: > { %9209 = sst [smem:[#allocation5_spill]] %s7086_s21  ;;  %s7208_s25 = sadd.s32 4294967295, %s7098_s24   ;;  %s7098_s24 = sphi %s7193_s24, %s9226_s24   ;;  %s7094_s23 = sphi %s7191_s23, %s9228_s23   ;;  %s7090_s22 = sphi %s7189_s22, %s9230_s22   ;;  %s7086_s21 = sphi %s7187_s21, %s9229_s21  }
   0x8   : > { %9210 = sst [smem:[#allocation6_spill]] %s7094_s23  ;;  %s5411_s26 = sadd.s32 4294967294, %s7098_s24  }
   0x9   : > { %9211 = sst [smem:[#allocation7_spill]] %s7098_s24  ;;  %s7212_s27 = sadd.s32 1, %s7098_s24  }
   0xa   : > { %9212 = sst [smem:[#allocation8_spill]] %s7212_s27  ;;  %s393_s28 = sadd.s32 1, %s7094_s23 }
   0xb   : > { %s390_s29 = ssub.s32 %s7098_s24, %s7212_s27  ;;  %p403_p0 = scmp.ne.s32.totalorder %s7094_s23, %s7090_s22 }
   0xc   : > { %p391_p1 = scmp.eq.s32.totalorder %s390_s29, 0  ;;  %p404_p2 = scmp.eq.s32.totalorder %s7208_s25, 2 }
   0xd   : > { %p409_p3 = scmp.ne.s32.totalorder %s7090_s22, %s7086_s21  ;;  %p410_p4 = scmp.eq.s32.totalorder %s5411_s26, 2 }
   0xe   : > { %s7223_s30 = scalar_select %p391_p1, %s7094_s23, %s393_s28  }
   0xf   : > { %p7225_p5 = por %p404_p2, %p403_p0  ;;  %p7229_p6 = por %p410_p4, %p409_p3 }
  0x10   : > { %9213 = sst [smem:[#allocation9_spill]] %s7223_s30  ;;  %p5414_p7 = scmp.ge.s32.totalorder %s7098_s24, 1 }
  0x11   : > { %s9215_s17 = scalar_select %p7229_p6, 1, 0 }
  0x12   : > { %p480_p8 = scmp.lt.s32.totalorder %s7098_s24, 4 }
  0x13   : > { %9216 = sst [smem:[#allocation10_spill]] %s9215_s17 }
  0x14   : > { %p481_p9 = pnand %p5414_p7, %p480_p8 }
  0x15   : > { %v6183_v0 = vld [vmem:[%s9184_s2 + $0x4] ss:$16 sps:$4 sm:$0xff] (!%p481_p9)   ;;  %v6185_v1 = vld [vmem:[%s9184_s2 + $0xc] ss:$16 sps:$4 sm:$0xff] (!%p481_p9)   ;;  %v6187_v2 = vld [vmem:[%s9184_s2] ss:$16 sps:$4 sm:$0xff] (!%p481_p9)  }
  0x16   : > { %484 = sbr.rel (%p481_p9) target bundleno = 2003 (0x7d3), region = 76  ;;  %1799 = vmatprep.subr.bf16.mxu0 (!%p481_p9), %v6183_v0  ;;  %v6188_v3 = vld [vmem:[%s9184_s2 + $0x8] ss:$16 sps:$4 sm:$0xff] (!%p481_p9)   ;;  %1963 = vmatprep.subr.bf16.mxu1 (!%p481_p9), %v6185_v1  ;;  %v6189_v4 = vld [vmem:[%s9184_s2 + $0x24] ss:$16 sps:$4 sm:$0xff] (!%p481_p9)   ;;  %p543_p10 = scmp.lt.s32.totalorder (!%p481_p9), %s7208_s25, 2 }
  0x17   : > { %1800 = vmatpush1.bf16.msra.mxu0 (!%p481_p9), %v6187_v2  ;;  %1964 = vmatpush1.bf16.msra.mxu1 (!%p481_p9), %v6188_v3  ;;  %v6191_v5 = vld [vmem:[%s9184_s2 + $0x2c] ss:$16 sps:$4 sm:$0xff] (!%p481_p9)   ;;  %v6193_v6 = vld [vmem:[%s9184_s2 + $0x20] ss:$16 sps:$4 sm:$0xff] (!%p481_p9)   ;;  %v6194_v7 = vld [vmem:[%s9184_s2 + $0x28] ss:$16 sps:$4 sm:$0xff] (!%p481_p9)  }
  0x18   : > { %1801 = vmatprep.subr.bf16.mxu0 (!%p481_p9), %v6189_v4  ;;  %1965 = vmatprep.subr.bf16.mxu1 (!%p481_p9), %v6191_v5  ;;  %v6195_v8 = vld [vmem:[%s9184_s2 + $0x44] ss:$16 sps:$4 sm:$0xff] (!%p481_p9)   ;;  %v6197_v9 = vld [vmem:[%s9184_s2 + $0x4c] ss:$16 sps:$4 sm:$0xff] (!%p481_p9)   ;;  %v6199_v10 = vld [vmem:[%s9184_s2 + $0x40] ss:$16 sps:$4 sm:$0xff] (!%p481_p9)  }
  0x19   : > { %v6200_v11 = vld [vmem:[%s9184_s2 + $0x48] ss:$16 sps:$4 sm:$0xff] (!%p481_p9)   ;;  %v6201_v12 = vld [vmem:[%s9184_s2 + $0x64] ss:$16 sps:$4 sm:$0xff] (!%p481_p9)   ;;  %v6203_v13 = vld [vmem:[%s9184_s2 + $0x6c] ss:$16 sps:$4 sm:$0xff] (!%p481_p9)  }
  0x1a   : > { %v6205_v14 = vld [vmem:[%s9184_s2 + $0x60] ss:$16 sps:$4 sm:$0xff] (!%p481_p9)   ;;  %v6206_v15 = vld [vmem:[%s9184_s2 + $0x68] ss:$16 sps:$4 sm:$0xff] (!%p481_p9)   ;;  %v6207_v16 = vld [vmem:[%s9184_s2 + $0x84] ss:$16 sps:$4 sm:$0xff] (!%p481_p9)  }
  0x1b   : > { %1802 = vmatpush1.bf16.msra.mxu0 (!%p481_p9), %v6193_v6  ;;  %1966 = vmatpush1.bf16.msra.mxu1 (!%p481_p9), %v6194_v7  ;;  %v6209_v17 = vld [vmem:[%s9184_s2 + $0x8c] ss:$16 sps:$4 sm:$0xff] (!%p481_p9)   ;;  %v6211_v18 = vld [vmem:[%s9184_s2 + $0x80] ss:$16 sps:$4 sm:$0xff] (!%p481_p9)   ;;  %v6212_v19 = vld [vmem:[%s9184_s2 + $0x88] ss:$16 sps:$4 sm:$0xff] (!%p481_p9)  }
  0x1c   : > { %1803 = vmatprep.subr.bf16.mxu0 (!%p481_p9), %v6195_v8  ;;  %1967 = vmatprep.subr.bf16.mxu1 (!%p481_p9), %v6197_v9  ;;  %v6213_v20 = vld [vmem:[%s9184_s2 + $0xa4] ss:$16 sps:$4 sm:$0xff] (!%p481_p9)   ;;  %v6215_v21 = vld [vmem:[%s9184_s2 + $0xac] ss:$16 sps:$4 sm:$0xff] (!%p481_p9)   ;;  %v6217_v22 = vld [vmem:[%s9184_s2 + $0xa0] ss:$16 sps:$4 sm:$0xff] (!%p481_p9)  }
  0x1d   : > { %v6218_v23 = vld [vmem:[%s9184_s2 + $0xa8] ss:$16 sps:$4 sm:$0xff]   ;;  %v6219_v24 = vld [vmem:[%s9184_s2 + $0xc4] ss:$16 sps:$4 sm:$0xff]   ;;  %v6221_v25 = vld [vmem:[%s9184_s2 + $0xcc] ss:$16 sps:$4 sm:$0xff]  }
  0x1e   : > { %v6223_v26 = vld [vmem:[%s9184_s2 + $0xc0] ss:$16 sps:$4 sm:$0xff]   ;;  %v6224_v27 = vld [vmem:[%s9184_s2 + $0xc8] ss:$16 sps:$4 sm:$0xff]   ;;  %v6225_v28 = vld [vmem:[%s9184_s2 + $0xe4] ss:$16 sps:$4 sm:$0xff]  }
  0x1f   : > { %1804 = vmatpush1.bf16.msra.mxu0 %v6199_v10  ;;  %1968 = vmatpush1.bf16.msra.mxu1 %v6200_v11  ;;  %v6227_v29 = vld [vmem:[%s9184_s2 + $0xec] ss:$16 sps:$4 sm:$0xff]   ;;  %v6229_v30 = vld [vmem:[%s9184_s2 + $0xe0] ss:$16 sps:$4 sm:$0xff]   ;;  %v6230_v31 = vld [vmem:[%s9184_s2 + $0xe8] ss:$16 sps:$4 sm:$0xff]  }
  0x20   : > { %1805 = vmatprep.subr.bf16.mxu0 %v6201_v12  ;;  %1969 = vmatprep.subr.bf16.mxu1 %v6203_v13  ;;  %v6231_v32 = vld [vmem:[%s9184_s2 + $0x104] ss:$16 sps:$4 sm:$0xff]   ;;  %v6233_v33 = vld [vmem:[%s9184_s2 + $0x10c] ss:$16 sps:$4 sm:$0xff]   ;;  %v6235_v34 = vld [vmem:[%s9184_s2 + $0x100] ss:$16 sps:$4 sm:$0xff]  }
  0x21   : > { %v6236_v35 = vld [vmem:[%s9184_s2 + $0x108] ss:$16 sps:$4 sm:$0xff]   ;;  %s7345_s20 = scalar_select %p543_p10, %s7208_s25, 2  ;;  %v6237_v36 = vld [vmem:[%s9184_s2 + $0x124] ss:$16 sps:$4 sm:$0xff]   ;;  %vm1795_vm0 = vcmask 130048  }
  0x22   : > { %v6239_v37 = vld [vmem:[%s9184_s2 + $0x12c] ss:$16 sps:$4 sm:$0xff]   ;;  %v6241_v38 = vld [vmem:[%s9184_s2 + $0x120] ss:$16 sps:$4 sm:$0xff]   ;;  %v6242_v39 = vld [vmem:[%s9184_s2 + $0x128] ss:$16 sps:$4 sm:$0xff]  }
  0x23   : > { %1806 = vmatpush1.bf16.msra.mxu0 %v6205_v14  ;;  %1970 = vmatpush1.bf16.msra.mxu1 %v6206_v15  ;;  %v6243_v40 = vld [vmem:[%s9184_s2 + $0x144] ss:$16 sps:$4 sm:$0xff]   ;;  %v6245_v41 = vld [vmem:[%s9184_s2 + $0x14c] ss:$16 sps:$4 sm:$0xff]   ;;  %v6247_v42 = vld [vmem:[%s9184_s2 + $0x140] ss:$16 sps:$4 sm:$0xff]  }
  0x24   : > { %1807 = vmatprep.subr.bf16.mxu0 %v6207_v16  ;;  %1971 = vmatprep.subr.bf16.mxu1 %v6209_v17  ;;  %v6248_v43 = vld [vmem:[%s9184_s2 + $0x148] ss:$16 sps:$4 sm:$0xff]   ;;  %s9217_s18 = smul.u32 28, %s7345_s20  ;;  %s9218_s14 = sld [smem:[#allocation11_spill]]  ;;  %v6249_v44 = vld [vmem:[%s9184_s2 + $0x164] ss:$16 sps:$4 sm:$0xff]  }
  0x25   : > { %v6251_v45 = vld [vmem:[%s9184_s2 + $0x16c] ss:$16 sps:$4 sm:$0xff]   ;;  %v6253_v47 = vld [vmem:[%s9184_s2 + $0x160] ss:$16 sps:$4 sm:$0xff]   ;;  %v6254_v49 = vld [vmem:[%s9184_s2 + $0x168] ss:$16 sps:$4 sm:$0xff]  }
  0x26   : > { %v6255_v50 = vld [vmem:[%s9184_s2 + $0x184] ss:$16 sps:$4 sm:$0xff]   ;;  %v6257_v51 = vld [vmem:[%s9184_s2 + $0x18c] ss:$16 sps:$4 sm:$0xff]   ;;  %v6259_v52 = vld [vmem:[%s9184_s2 + $0x180] ss:$16 sps:$4 sm:$0xff]  }
  0x27   : > { %1808 = vmatpush1.bf16.msra.mxu0 %v6211_v18  ;;  %1972 = vmatpush1.bf16.msra.mxu1 %v6212_v19  ;;  %v6260_v53 = vld [vmem:[%s9184_s2 + $0x188] ss:$16 sps:$4 sm:$0xff]   ;;  %v6261_v54 = vld [vmem:[%s9184_s2 + $0x1a4] ss:$16 sps:$4 sm:$0xff]   ;;  %v6263_v55 = vld [vmem:[%s9184_s2 + $0x1ac] ss:$16 sps:$4 sm:$0xff]  }
  0x28   : > { %1809 = vmatprep.subr.bf16.mxu0 %v6213_v20  ;;  %1973 = vmatprep.subr.bf16.mxu1 %v6215_v21  ;;  %v6265_v56 = vld [vmem:[%s9184_s2 + $0x1a0] ss:$16 sps:$4 sm:$0xff]   ;;  %v6266_v57 = vld [vmem:[%s9184_s2 + $0x1a8] ss:$16 sps:$4 sm:$0xff]   ;;  %v6267_v58 = vld [vmem:[%s9184_s2 + $0x1c4] ss:$16 sps:$4 sm:$0xff]  }
  0x29   : > { %v6269_v59 = vld [vmem:[%s9184_s2 + $0x1cc] ss:$16 sps:$4 sm:$0xff]   ;;  %v6271_v60 = vld [vmem:[%s9184_s2 + $0x1c0] ss:$16 sps:$4 sm:$0xff]   ;;  %v6272_v61 = vld [vmem:[%s9184_s2 + $0x1c8] ss:$16 sps:$4 sm:$0xff]  }
  0x2a   : > { %s7377_s26 = scalar_lea.vmem %s9218_s14, %s9217_s18  ;;  %v6273_v62 = vld [vmem:[%s9184_s2 + $0x1e4] ss:$16 sps:$4 sm:$0xff]   ;;  %v6275_v63 = vld [vmem:[%s9184_s2 + $0x1ec] ss:$16 sps:$4 sm:$0xff]   ;;  %v6277_v0 = vld [vmem:[%s9184_s2 + $0x1e0] ss:$16 sps:$4 sm:$0xff]  }
  0x2b   : > { %1810 = vmatpush1.bf16.msra.mxu0 %v6217_v22  ;;  %1974 = vmatpush1.bf16.msra.mxu1 %v6218_v23  ;;  %v562_v46 = vld [vmem:[%s7377_s26] sm:$0xff]  ;;  %v6278_v1 = vld [vmem:[%s9184_s2 + $0x1e8] ss:$16 sps:$4 sm:$0xff]   ;;  %v6287_v3 = vld [vmem:[%s9184_s2 + $0x20c] ss:$16 sps:$4 sm:$0xff]   ;;  %s9205_s29 = sand.u32 1, %s7090_s22  }
  0x2c   : > { %1811 = vmatprep.subr.bf16.mxu0 %v6219_v24  ;;  %1975 = vmatprep.subr.bf16.mxu1 %v6221_v25  ;;  %v5420_v48 = vcombine.high %v562_v46, %v562_v46  ;;  %v6284_v2 = vld [vmem:[%s9184_s2 + $0x204] ss:$16 sps:$4 sm:$0xff]   ;;  %v5419_v4 = vcombine.low %v562_v46, %v562_v46  ;;  %v6282_v5 = vld [vmem:[%s9184_s2 + $0x200] ss:$16 sps:$4 sm:$0xff]   ;;  %v6285_v6 = vld [vmem:[%s9184_s2 + $0x208] ss:$16 sps:$4 sm:$0xff]  }
  0x2d   : > { %v6290_v7 = vld [vmem:[%s9184_s2 + $0x224] ss:$16 sps:$4 sm:$0xff]   ;;  %v6293_v8 = vld [vmem:[%s9184_s2 + $0x22c] ss:$16 sps:$4 sm:$0xff]   ;;  %v6288_v9 = vld [vmem:[%s9184_s2 + $0x220] ss:$16 sps:$4 sm:$0xff]  }
  0x2e   : > { %1831 = vmatprep.mubr.bf16.mxu0 %v5420_v48  ;;  %1995 = vmatprep.mubr.bf16.mxu1 %v5420_v48  ;;  %v6291_v10 = vld [vmem:[%s9184_s2 + $0x228] ss:$16 sps:$4 sm:$0xff]   ;;  %v6296_v11 = vld [vmem:[%s9184_s2 + $0x244] ss:$16 sps:$4 sm:$0xff]   ;;  %v6299_v12 = vld [vmem:[%s9184_s2 + $0x24c] ss:$16 sps:$4 sm:$0xff]  }
  0x2f   : > { %1812 = vmatpush1.bf16.msra.mxu0 %v6223_v26  ;;  %1976 = vmatpush1.bf16.msra.mxu1 %v6224_v27  ;;  %v6294_v13 = vld [vmem:[%s9184_s2 + $0x240] ss:$16 sps:$4 sm:$0xff]   ;;  %v6297_v14 = vld [vmem:[%s9184_s2 + $0x248] ss:$16 sps:$4 sm:$0xff]   ;;  %v6302_v15 = vld [vmem:[%s9184_s2 + $0x264] ss:$16 sps:$4 sm:$0xff]  }
  0x30   : > { %1813 = vmatprep.subr.bf16.mxu0 %v6225_v28  ;;  %1977 = vmatprep.subr.bf16.mxu1 %v6227_v29  ;;  %v6305_v16 = vld [vmem:[%s9184_s2 + $0x26c] ss:$16 sps:$4 sm:$0xff]   ;;  %v6300_v17 = vld [vmem:[%s9184_s2 + $0x260] ss:$16 sps:$4 sm:$0xff]   ;;  %v6303_v18 = vld [vmem:[%s9184_s2 + $0x268] ss:$16 sps:$4 sm:$0xff]  }
  0x31   : > { %v6308_v19 = vld [vmem:[%s9184_s2 + $0x284] ss:$16 sps:$4 sm:$0xff]   ;;  %v6311_v20 = vld [vmem:[%s9184_s2 + $0x28c] ss:$16 sps:$4 sm:$0xff]   ;;  %v6306_v21 = vld [vmem:[%s9184_s2 + $0x280] ss:$16 sps:$4 sm:$0xff]  }
  0x32   : > { %v6309_v22 = vld [vmem:[%s9184_s2 + $0x288] ss:$16 sps:$4 sm:$0xff]   ;;  %v6314_v23 = vld [vmem:[%s9184_s2 + $0x2a4] ss:$16 sps:$4 sm:$0xff]   ;;  %v6317_v24 = vld [vmem:[%s9184_s2 + $0x2ac] ss:$16 sps:$4 sm:$0xff]  }
  0x33   : > { %1814 = vmatpush1.bf16.msra.mxu0 %v6229_v30  ;;  %1978 = vmatpush1.bf16.msra.mxu1 %v6230_v31  ;;  %v6312_v25 = vld [vmem:[%s9184_s2 + $0x2a0] ss:$16 sps:$4 sm:$0xff]   ;;  %v6315_v26 = vld [vmem:[%s9184_s2 + $0x2a8] ss:$16 sps:$4 sm:$0xff]   ;;  %v6320_v27 = vld [vmem:[%s9184_s2 + $0x2c4] ss:$16 sps:$4 sm:$0xff]  }
  0x34   : > { %1815 = vmatprep.subr.bf16.mxu0 %v6231_v32  ;;  %1979 = vmatprep.subr.bf16.mxu1 %v6233_v33  ;;  %v6323_v28 = vld [vmem:[%s9184_s2 + $0x2cc] ss:$16 sps:$4 sm:$0xff]   ;;  %v6318_v30 = vld [vmem:[%s9184_s2 + $0x2c0] ss:$16 sps:$4 sm:$0xff]   ;;  %v6321_v31 = vld [vmem:[%s9184_s2 + $0x2c8] ss:$16 sps:$4 sm:$0xff]  }
  0x35   : > { %v7519_v29 = vld [vmem:[%s7377_s26 + $0x8] sm:$0xff]  ;;  %v6326_v33 = vld [vmem:[%s9184_s2 + $0x2e4] ss:$16 sps:$4 sm:$0xff]   ;;  %s8275_s23 = sshll.u32 %s9205_s29, 3  ;;  %s6140_s30 = smul.u32 56, %s7345_s20  ;;  %vm5265_vm1 = vcmask 125952  }
  0x36   : > { %v5422_v32 = vcombine.high %v7519_v29, %v7519_v29  ;;  %v6347_v46 = vld [vmem:[%s9184_s2 + $0x34c] ss:$16 sps:$4 sm:$0xff]   ;;  %v6345_v48 = vld [vmem:[%s9184_s2 + $0x348] ss:$16 sps:$4 sm:$0xff]   ;;  %s542_s18 = scalar_lea.vmem [#allocation2], %s8275_s23  ;;  %s9219_s1 = sld [smem:[#allocation12_spill]] }
  0x37   : > { %1816 = vmatpush1.bf16.msra.mxu0 %v6235_v34  ;;  %1980 = vmatpush1.bf16.msra.mxu1 %v6236_v35  ;;  %v6329_v34 = vld [vmem:[%s9184_s2 + $0x2ec] ss:$16 sps:$4 sm:$0xff]   ;;  %v6324_v35 = vld [vmem:[%s9184_s2 + $0x2e0] ss:$16 sps:$4 sm:$0xff]   ;;  %s9220_s19 = smul.u32 28, %s7345_s20  ;;  %s7101_s21 = smov [#allocation2]  }
  0x38   : > { %1817 = vmatprep.subr.bf16.mxu0 %v6237_v36  ;;  %1981 = vmatprep.subr.bf16.mxu1 %v6239_v37  ;;  %v6327_v36 = vld [vmem:[%s9184_s2 + $0x2e8] ss:$16 sps:$4 sm:$0xff]   ;;  %v6332_v37 = vld [vmem:[%s9184_s2 + $0x304] ss:$16 sps:$4 sm:$0xff]  }
  0x39   : > { %s9120_s17 = scalar_lea.vmem %s9197_s15, %s9220_s19 }
  0x3b   : > { %1818 = vmatpush1.bf16.msra.mxu0 %v6241_v38  ;;  %1982 = vmatpush1.bf16.msra.mxu1 %v6242_v39  ;;  %v6335_v38 = vld [vmem:[%s9184_s2 + $0x30c] ss:$16 sps:$4 sm:$0xff]   ;;  %v6330_v39 = vld [vmem:[%s9184_s2 + $0x300] ss:$16 sps:$4 sm:$0xff]  }
  0x3c   : > { %1819 = vmatprep.subr.bf16.mxu0 %v6243_v40  ;;  %1983 = vmatprep.subr.bf16.mxu1 %v6245_v41  ;;  %v6333_v40 = vld [vmem:[%s9184_s2 + $0x308] ss:$16 sps:$4 sm:$0xff]   ;;  %v6338_v41 = vld [vmem:[%s9184_s2 + $0x324] ss:$16 sps:$4 sm:$0xff]   ;;  %s9106_s27 = scalar_lea.vmem %s9219_s1, %s6140_s30  ;;  %s6014_s30 = sshll.u32 %s7208_s25, 7 }
  0x3d   : > { %s9140_s29 = scalar_lea.hbm %s9198_s16, %s6014_s30 }
  0x3f   : > { %1820 = vmatpush1.bf16.msra.mxu0 %v6247_v42  ;;  %1984 = vmatpush1.bf16.msra.mxu1 %v6248_v43  ;;  %v6341_v42 = vld [vmem:[%s9184_s2 + $0x32c] ss:$16 sps:$4 sm:$0xff]   ;;  %v6336_v43 = vld [vmem:[%s9184_s2 + $0x320] ss:$16 sps:$4 sm:$0xff]  }
  0x40   : > { %1821 = vmatprep.subr.bf16.mxu0 %v6249_v44  ;;  %1985 = vmatprep.subr.bf16.mxu1 %v6251_v45  ;;  %v6339_v44 = vld [vmem:[%s9184_s2 + $0x328] ss:$16 sps:$4 sm:$0xff]   ;;  %v6344_v45 = vld [vmem:[%s9184_s2 + $0x344] ss:$16 sps:$4 sm:$0xff]  }
  0x43   : > { %1822 = vmatpush1.bf16.msra.mxu0 %v6253_v47  ;;  %1986 = vmatpush1.bf16.msra.mxu1 %v6254_v49  ;;  %v6342_v47 = vld [vmem:[%s9184_s2 + $0x340] ss:$16 sps:$4 sm:$0xff]   ;;  %v6350_v49 = vld [vmem:[%s9184_s2 + $0x364] ss:$16 sps:$4 sm:$0xff]  }
  0x44   : > { %1823 = vmatprep.subr.bf16.mxu0 %v6255_v50  ;;  %1987 = vmatprep.subr.bf16.mxu1 %v6257_v51  ;;  %v6353_v50 = vld [vmem:[%s9184_s2 + $0x36c] ss:$16 sps:$4 sm:$0xff]   ;;  %v6348_v51 = vld [vmem:[%s9184_s2 + $0x360] ss:$16 sps:$4 sm:$0xff]  }
  0x47   : > { %1824 = vmatpush1.bf16.msra.mxu0 %v6259_v52  ;;  %1988 = vmatpush1.bf16.msra.mxu1 %v6260_v53  ;;  %v6351_v52 = vld [vmem:[%s9184_s2 + $0x368] ss:$16 sps:$4 sm:$0xff]   ;;  %v6356_v53 = vld [vmem:[%s9184_s2 + $0x384] ss:$16 sps:$4 sm:$0xff]  }
  0x48   : > { %1825 = vmatprep.subr.bf16.mxu0 %v6261_v54  ;;  %1989 = vmatprep.subr.bf16.mxu1 %v6263_v55  ;;  %v6359_v54 = vld [vmem:[%s9184_s2 + $0x38c] ss:$16 sps:$4 sm:$0xff]   ;;  %v6354_v55 = vld [vmem:[%s9184_s2 + $0x380] ss:$16 sps:$4 sm:$0xff]  }
  0x4b   : > { %1826 = vmatpush1.bf16.msra.mxu0 %v6265_v56  ;;  %1990 = vmatpush1.bf16.msra.mxu1 %v6266_v57  ;;  %v6357_v56 = vld [vmem:[%s9184_s2 + $0x388] ss:$16 sps:$4 sm:$0xff]   ;;  %v6362_v57 = vld [vmem:[%s9184_s2 + $0x3a4] ss:$16 sps:$4 sm:$0xff]  }
  0x4c   : > { %1827 = vmatprep.subr.bf16.mxu0 %v6267_v58  ;;  %1991 = vmatprep.subr.bf16.mxu1 %v6269_v59  ;;  %v6365_v58 = vld [vmem:[%s9184_s2 + $0x3ac] ss:$16 sps:$4 sm:$0xff]   ;;  %v6360_v59 = vld [vmem:[%s9184_s2 + $0x3a0] ss:$16 sps:$4 sm:$0xff]  }
  0x4f   : > { %1828 = vmatpush1.bf16.msra.mxu0 %v6271_v60  ;;  %1992 = vmatpush1.bf16.msra.mxu1 %v6272_v61  ;;  %v6363_v60 = vld [vmem:[%s9184_s2 + $0x3a8] ss:$16 sps:$4 sm:$0xff]   ;;  %v6368_v61 = vld [vmem:[%s9184_s2 + $0x3c4] ss:$16 sps:$4 sm:$0xff]  }
  0x50   : > { %1829 = vmatprep.subr.bf16.mxu0 %v6273_v62  ;;  %1993 = vmatprep.subr.bf16.mxu1 %v6275_v63  ;;  %v6371_v62 = vld [vmem:[%s9184_s2 + $0x3cc] ss:$16 sps:$4 sm:$0xff]   ;;  %v6366_v63 = vld [vmem:[%s9184_s2 + $0x3c0] ss:$16 sps:$4 sm:$0xff]  }
  0x53   : > { %1830 = vmatpush1.bf16.msra.mxu0 %v6277_v0  ;;  %1994 = vmatpush1.bf16.msra.mxu1 %v6278_v1  ;;  %v6369_v0 = vld [vmem:[%s9184_s2 + $0x3c8] ss:$16 sps:$4 sm:$0xff]   ;;  %v6374_v1 = vld [vmem:[%s9184_s2 + $0x3e4] ss:$16 sps:$4 sm:$0xff]  }
  0x54   : > { %1840 = vmatprep.subr.bf16.mxu0 %v6284_v2  ;;  %2004 = vmatprep.subr.bf16.mxu1 %v6287_v3  ;;  %v6377_v2 = vld [vmem:[%s9184_s2 + $0x3ec] ss:$16 sps:$4 sm:$0xff]   ;;  %v6372_v3 = vld [vmem:[%s9184_s2 + $0x3e0] ss:$16 sps:$4 sm:$0xff]  }
  0x56   : > { %1832 = vmatmul.mubr.bf16.vlgmr.msra.gmra.mrb[0].mxu0 %v5419_v4  ;;  %1996 = vmatmul.mubr.bf16.vlgmr.msra.gmra.mrb[0].mxu1 %v5419_v4  ;;  %v6375_v4 = vld [vmem:[%s9184_s2 + $0x3e8] ss:$16 sps:$4 sm:$0xff]  }
  0x57   : > { %1841 = vmatpush1.bf16.msra.mxu0 %v6282_v5  ;;  %2005 = vmatpush1.bf16.msra.mxu1 %v6285_v6  ;;  %v6382_v5 = vld [vmem:[%s9184_s2 + $0x404] ss:$16 sps:$4 sm:$0xff]   ;;  %v6385_v6 = vld [vmem:[%s9184_s2 + $0x40c] ss:$16 sps:$4 sm:$0xff]  }
  0x58   : > { %1842 = vmatprep.subr.bf16.mxu0 %v6290_v7  ;;  %2006 = vmatprep.subr.bf16.mxu1 %v6293_v8  ;;  %v5421_v7 = vcombine.low %v7519_v29, %v7519_v29  ;;  %v6380_v8 = vld [vmem:[%s9184_s2 + $0x400] ss:$16 sps:$4 sm:$0xff]   ;;  %v6415_v29 = vld [vmem:[%s9184_s2 + $0x4ac] ss:$16 sps:$4 sm:$0xff]  }
  0x59   : > { %1872 = vmatprep.mubr.bf16.mxu0 %v5422_v32  ;;  %2036 = vmatprep.mubr.bf16.mxu1 %v5422_v32  ;;  %v6418_v32 = vld [vmem:[%s9184_s2 + $0x4c4] ss:$16 sps:$4 sm:$0xff]  }
  0x5b   : > { %1843 = vmatpush1.bf16.msra.mxu0 %v6288_v9  ;;  %2007 = vmatpush1.bf16.msra.mxu1 %v6291_v10  ;;  %v6383_v9 = vld [vmem:[%s9184_s2 + $0x408] ss:$16 sps:$4 sm:$0xff]   ;;  %v6388_v10 = vld [vmem:[%s9184_s2 + $0x424] ss:$16 sps:$4 sm:$0xff]  }
  0x5c   : > { %1844 = vmatprep.subr.bf16.mxu0 %v6296_v11  ;;  %2008 = vmatprep.subr.bf16.mxu1 %v6299_v12  ;;  %v6391_v11 = vld [vmem:[%s9184_s2 + $0x42c] ss:$16 sps:$4 sm:$0xff]   ;;  %v7658_v12 = vld [vmem:[%s7377_s26 + $0x10] sm:$0xff] }
  0x5f   : > { %1845 = vmatpush1.bf16.msra.mxu0 %v6294_v13  ;;  %2009 = vmatpush1.bf16.msra.mxu1 %v6297_v14  ;;  %v5424_v13 = vcombine.high %v7658_v12, %v7658_v12  ;;  %v6386_v14 = vld [vmem:[%s9184_s2 + $0x420] ss:$16 sps:$4 sm:$0xff]  }
  0x60   : > { %1846 = vmatprep.subr.bf16.mxu0 %v6302_v15  ;;  %2010 = vmatprep.subr.bf16.mxu1 %v6305_v16  ;;  %v6389_v15 = vld [vmem:[%s9184_s2 + $0x428] ss:$16 sps:$4 sm:$0xff]   ;;  %v6394_v16 = vld [vmem:[%s9184_s2 + $0x444] ss:$16 sps:$4 sm:$0xff]  }
  0x63   : > { %1847 = vmatpush1.bf16.msra.mxu0 %v6300_v17  ;;  %2011 = vmatpush1.bf16.msra.mxu1 %v6303_v18  ;;  %v6397_v17 = vld [vmem:[%s9184_s2 + $0x44c] ss:$16 sps:$4 sm:$0xff]   ;;  %v6392_v18 = vld [vmem:[%s9184_s2 + $0x440] ss:$16 sps:$4 sm:$0xff]  }
  0x64   : > { %1848 = vmatprep.subr.bf16.mxu0 %v6308_v19  ;;  %2012 = vmatprep.subr.bf16.mxu1 %v6311_v20  ;;  %v6395_v19 = vld [vmem:[%s9184_s2 + $0x448] ss:$16 sps:$4 sm:$0xff]   ;;  %v6400_v20 = vld [vmem:[%s9184_s2 + $0x464] ss:$16 sps:$4 sm:$0xff]  }
  0x67   : > { %1849 = vmatpush1.bf16.msra.mxu0 %v6306_v21  ;;  %2013 = vmatpush1.bf16.msra.mxu1 %v6309_v22  ;;  %v6403_v21 = vld [vmem:[%s9184_s2 + $0x46c] ss:$16 sps:$4 sm:$0xff]   ;;  %v6398_v22 = vld [vmem:[%s9184_s2 + $0x460] ss:$16 sps:$4 sm:$0xff]  }
  0x68   : > { %1850 = vmatprep.subr.bf16.mxu0 %v6314_v23  ;;  %2014 = vmatprep.subr.bf16.mxu1 %v6317_v24  ;;  %v6401_v23 = vld [vmem:[%s9184_s2 + $0x468] ss:$16 sps:$4 sm:$0xff]   ;;  %v6406_v24 = vld [vmem:[%s9184_s2 + $0x484] ss:$16 sps:$4 sm:$0xff]  }
  0x6b   : > { %1851 = vmatpush1.bf16.msra.mxu0 %v6312_v25  ;;  %2015 = vmatpush1.bf16.msra.mxu1 %v6315_v26  ;;  %v6409_v25 = vld [vmem:[%s9184_s2 + $0x48c] ss:$16 sps:$4 sm:$0xff]   ;;  %v6404_v26 = vld [vmem:[%s9184_s2 + $0x480] ss:$16 sps:$4 sm:$0xff]  }
  0x6c   : > { %1852 = vmatprep.subr.bf16.mxu0 %v6320_v27  ;;  %2016 = vmatprep.subr.bf16.mxu1 %v6323_v28  ;;  %v6407_v27 = vld [vmem:[%s9184_s2 + $0x488] ss:$16 sps:$4 sm:$0xff]   ;;  %v6412_v28 = vld [vmem:[%s9184_s2 + $0x4a4] ss:$16 sps:$4 sm:$0xff]  }
  0x6f   : > { %1853 = vmatpush1.bf16.msra.mxu0 %v6318_v30  ;;  %2017 = vmatpush1.bf16.msra.mxu1 %v6321_v31  ;;  %v6410_v30 = vld [vmem:[%s9184_s2 + $0x4a0] ss:$16 sps:$4 sm:$0xff]   ;;  %v6413_v31 = vld [vmem:[%s9184_s2 + $0x4a8] ss:$16 sps:$4 sm:$0xff]  }
  0x70   : > { %1854 = vmatprep.subr.bf16.mxu0 %v6326_v33  ;;  %2018 = vmatprep.subr.bf16.mxu1 %v6329_v34  ;;  %v6421_v33 = vld [vmem:[%s9184_s2 + $0x4cc] ss:$16 sps:$4 sm:$0xff]   ;;  %v6416_v34 = vld [vmem:[%s9184_s2 + $0x4c0] ss:$16 sps:$4 sm:$0xff]  }
  0x73   : > { %1855 = vmatpush1.bf16.msra.mxu0 %v6324_v35  ;;  %2019 = vmatpush1.bf16.msra.mxu1 %v6327_v36  ;;  %v6419_v35 = vld [vmem:[%s9184_s2 + $0x4c8] ss:$16 sps:$4 sm:$0xff]   ;;  %v6424_v36 = vld [vmem:[%s9184_s2 + $0x4e4] ss:$16 sps:$4 sm:$0xff]  }
  0x74   : > { %1856 = vmatprep.subr.bf16.mxu0 %v6332_v37  ;;  %2020 = vmatprep.subr.bf16.mxu1 %v6335_v38  ;;  %v6427_v37 = vld [vmem:[%s9184_s2 + $0x4ec] ss:$16 sps:$4 sm:$0xff]   ;;  %v6422_v38 = vld [vmem:[%s9184_s2 + $0x4e0] ss:$16 sps:$4 sm:$0xff]  }
  0x77   : > { %1857 = vmatpush1.bf16.msra.mxu0 %v6330_v39  ;;  %2021 = vmatpush1.bf16.msra.mxu1 %v6333_v40  ;;  %v6425_v39 = vld [vmem:[%s9184_s2 + $0x4e8] ss:$16 sps:$4 sm:$0xff]   ;;  %v6430_v40 = vld [vmem:[%s9184_s2 + $0x504] ss:$16 sps:$4 sm:$0xff]  }
  0x78   : > { %1858 = vmatprep.subr.bf16.mxu0 %v6338_v41  ;;  %2022 = vmatprep.subr.bf16.mxu1 %v6341_v42  ;;  %v6433_v41 = vld [vmem:[%s9184_s2 + $0x50c] ss:$16 sps:$4 sm:$0xff]   ;;  %v6428_v42 = vld [vmem:[%s9184_s2 + $0x500] ss:$16 sps:$4 sm:$0xff]  }
  0x7b   : > { %1859 = vmatpush1.bf16.msra.mxu0 %v6336_v43  ;;  %2023 = vmatpush1.bf16.msra.mxu1 %v6339_v44  ;;  %v6431_v43 = vld [vmem:[%s9184_s2 + $0x508] ss:$16 sps:$4 sm:$0xff]   ;;  %v6436_v44 = vld [vmem:[%s9184_s2 + $0x524] ss:$16 sps:$4 sm:$0xff]  }
  0x7c   : > { %1860 = vmatprep.subr.bf16.mxu0 %v6344_v45  ;;  %2024 = vmatprep.subr.bf16.mxu1 %v6347_v46  ;;  %v6439_v45 = vld [vmem:[%s9184_s2 + $0x52c] ss:$16 sps:$4 sm:$0xff]   ;;  %v6434_v46 = vld [vmem:[%s9184_s2 + $0x520] ss:$16 sps:$4 sm:$0xff]  }
  0x7f   : > { %1861 = vmatpush1.bf16.msra.mxu0 %v6342_v47  ;;  %2025 = vmatpush1.bf16.msra.mxu1 %v6345_v48  ;;  %v6437_v47 = vld [vmem:[%s9184_s2 + $0x528] ss:$16 sps:$4 sm:$0xff]   ;;  %v6442_v48 = vld [vmem:[%s9184_s2 + $0x544] ss:$16 sps:$4 sm:$0xff]  }
  0x80   : > { %1862 = vmatprep.subr.bf16.mxu0 %v6350_v49  ;;  %2026 = vmatprep.subr.bf16.mxu1 %v6353_v50  ;;  %v6445_v49 = vld [vmem:[%s9184_s2 + $0x54c] ss:$16 sps:$4 sm:$0xff]   ;;  %v6440_v50 = vld [vmem:[%s9184_s2 + $0x540] ss:$16 sps:$4 sm:$0xff]  }
  0x83   : > { %1863 = vmatpush1.bf16.msra.mxu0 %v6348_v51  ;;  %2027 = vmatpush1.bf16.msra.mxu1 %v6351_v52  ;;  %v6443_v51 = vld [vmem:[%s9184_s2 + $0x548] ss:$16 sps:$4 sm:$0xff]   ;;  %v6448_v52 = vld [vmem:[%s9184_s2 + $0x564] ss:$16 sps:$4 sm:$0xff]  }
  0x84   : > { %1864 = vmatprep.subr.bf16.mxu0 %v6356_v53  ;;  %2028 = vmatprep.subr.bf16.mxu1 %v6359_v54  ;;  %v6451_v53 = vld [vmem:[%s9184_s2 + $0x56c] ss:$16 sps:$4 sm:$0xff]   ;;  %v6446_v54 = vld [vmem:[%s9184_s2 + $0x560] ss:$16 sps:$4 sm:$0xff]  }
  0x87   : > { %1865 = vmatpush1.bf16.msra.mxu0 %v6354_v55  ;;  %2029 = vmatpush1.bf16.msra.mxu1 %v6357_v56  ;;  %v6449_v55 = vld [vmem:[%s9184_s2 + $0x568] ss:$16 sps:$4 sm:$0xff]   ;;  %v6454_v56 = vld [vmem:[%s9184_s2 + $0x584] ss:$16 sps:$4 sm:$0xff]  }
  0x88   : > { %1866 = vmatprep.subr.bf16.mxu0 %v6362_v57  ;;  %2030 = vmatprep.subr.bf16.mxu1 %v6365_v58  ;;  %v6457_v57 = vld [vmem:[%s9184_s2 + $0x58c] ss:$16 sps:$4 sm:$0xff]   ;;  %v6452_v58 = vld [vmem:[%s9184_s2 + $0x580] ss:$16 sps:$4 sm:$0xff]  }
  0x8b   : > { %1867 = vmatpush1.bf16.msra.mxu0 %v6360_v59  ;;  %2031 = vmatpush1.bf16.msra.mxu1 %v6363_v60  ;;  %v6455_v59 = vld [vmem:[%s9184_s2 + $0x588] ss:$16 sps:$4 sm:$0xff]   ;;  %v6460_v60 = vld [vmem:[%s9184_s2 + $0x5a4] ss:$16 sps:$4 sm:$0xff]  }
  0x8c   : > { %1868 = vmatprep.subr.bf16.mxu0 %v6368_v61  ;;  %2032 = vmatprep.subr.bf16.mxu1 %v6371_v62  ;;  %v6463_v61 = vld [vmem:[%s9184_s2 + $0x5ac] ss:$16 sps:$4 sm:$0xff]   ;;  %v6458_v62 = vld [vmem:[%s9184_s2 + $0x5a0] ss:$16 sps:$4 sm:$0xff]  }
  0x8f   : > { %1869 = vmatpush1.bf16.msra.mxu0 %v6366_v63  ;;  %2033 = vmatpush1.bf16.msra.mxu1 %v6369_v0  ;;  %v6461_v63 = vld [vmem:[%s9184_s2 + $0x5a8] ss:$16 sps:$4 sm:$0xff]   ;;  %v6466_v0 = vld [vmem:[%s9184_s2 + $0x5c4] ss:$16 sps:$4 sm:$0xff]  }
  0x90   : > { %1870 = vmatprep.subr.bf16.mxu0 %v6374_v1  ;;  %2034 = vmatprep.subr.bf16.mxu1 %v6377_v2  ;;  %v6469_v1 = vld [vmem:[%s9184_s2 + $0x5cc] ss:$16 sps:$4 sm:$0xff]   ;;  %v6464_v2 = vld [vmem:[%s9184_s2 + $0x5c0] ss:$16 sps:$4 sm:$0xff]  }
  0x93   : > { %1871 = vmatpush1.bf16.msra.mxu0 %v6372_v3  ;;  %2035 = vmatpush1.bf16.msra.mxu1 %v6375_v4  ;;  %v6467_v3 = vld [vmem:[%s9184_s2 + $0x5c8] ss:$16 sps:$4 sm:$0xff]   ;;  %v6472_v4 = vld [vmem:[%s9184_s2 + $0x5e4] ss:$16 sps:$4 sm:$0xff]  }
  0x94   : > { %1881 = vmatprep.subr.bf16.mxu0 %v6382_v5  ;;  %2045 = vmatprep.subr.bf16.mxu1 %v6385_v6  ;;  %v6475_v5 = vld [vmem:[%s9184_s2 + $0x5ec] ss:$16 sps:$4 sm:$0xff]   ;;  %v6470_v6 = vld [vmem:[%s9184_s2 + $0x5e0] ss:$16 sps:$4 sm:$0xff]  }
  0x96   : > { %1873 = vmatmul.mubr.bf16.vlgmr.msra.gmra.mrb[0].mxu0 %v5421_v7  ;;  %2037 = vmatmul.mubr.bf16.vlgmr.msra.gmra.mrb[0].mxu1 %v5421_v7  ;;  %v6473_v7 = vld [vmem:[%s9184_s2 + $0x5e8] ss:$16 sps:$4 sm:$0xff]  }
  0x97   : > { %1882 = vmatpush1.bf16.msra.mxu0 %v6380_v8  ;;  %2046 = vmatpush1.bf16.msra.mxu1 %v6383_v9  ;;  %v6480_v8 = vld [vmem:[%s9184_s2 + $0x604] ss:$16 sps:$4 sm:$0xff]   ;;  %v6483_v9 = vld [vmem:[%s9184_s2 + $0x60c] ss:$16 sps:$4 sm:$0xff]  }
  0x98   : > { %1883 = vmatprep.subr.bf16.mxu0 %v6388_v10  ;;  %2047 = vmatprep.subr.bf16.mxu1 %v6391_v11  ;;  %v6478_v10 = vld [vmem:[%s9184_s2 + $0x600] ss:$16 sps:$4 sm:$0xff]   ;;  %v6481_v11 = vld [vmem:[%s9184_s2 + $0x608] ss:$16 sps:$4 sm:$0xff]  }
  0x99   : > { %1913 = vmatprep.mubr.bf16.mxu0 %v5424_v13  ;;  %2077 = vmatprep.mubr.bf16.mxu1 %v5424_v13  ;;  %v5423_v13 = vcombine.low %v7658_v12, %v7658_v12  ;;  %v6484_v12 = vld [vmem:[%s9186_s4] ss:$8 sps:$4 sm:$0xff]  }
  0x9b   : > { %1884 = vmatpush1.bf16.msra.mxu0 %v6386_v14  ;;  %2048 = vmatpush1.bf16.msra.mxu1 %v6389_v15  ;;  %v6486_v14 = vld [vmem:[%s9186_s4 + $0x4] ss:$8 sps:$4 sm:$0xff]   ;;  %v7100_v15 = vmov 0  }
  0x9c   : > { %1885 = vmatprep.subr.bf16.mxu0 %v6394_v16  ;;  %2049 = vmatprep.subr.bf16.mxu1 %v6397_v17  ;;  %v6281_v16 = vld [vmem:[%s7377_s26 + $0x18] ss:$0 sps:$4 sm:$0xff]   ;;  %v6489_v17 = vld [vmem:[%s9186_s4 + $0x14] ss:$8 sps:$4 sm:$0xff]   ;;  %s5296_s26 = sshll.u32 %s542_s18, 4  ;;  %s5297_s26 = int_to_ptr.vmem [resolvable:$true] %s5296_s26 }
  0x9d   : > { %s7036_s28 = scalar_lea.vmem %s5297_s26, 128 }
  0x9e   : > { %p7037_p11 = scmp.ne.s32.totalorder %s5297_s26, %s7036_s28 }
  0x9f   : > { %1886 = vmatpush1.bf16.msra.mxu0 %v6392_v18  ;;  %2050 = vmatpush1.bf16.msra.mxu1 %v6395_v19  ;;  %v6487_v18 = vld [vmem:[%s9186_s4 + $0x10] ss:$8 sps:$4 sm:$0xff]   ;;  %v6492_v19 = vld [vmem:[%s9186_s4 + $0x24] ss:$8 sps:$4 sm:$0xff]  }
  0xa0   : > { %1887 = vmatprep.subr.bf16.mxu0 %v6400_v20  ;;  %2051 = vmatprep.subr.bf16.mxu1 %v6403_v21  ;;  %v6490_v20 = vld [vmem:[%s9186_s4 + $0x20] ss:$8 sps:$4 sm:$0xff]   ;;  %v6495_v21 = vld [vmem:[%s9186_s4 + $0x34] ss:$8 sps:$4 sm:$0xff]   ;;  %p7038_p12 = pnand %p7037_p11, %p7225_p5 }
  0xa2   : > { %p7039_p13 = pneg %p7038_p12 }
  0xa3   : > { %1888 = vmatpush1.bf16.msra.mxu0 %v6398_v22  ;;  %2052 = vmatpush1.bf16.msra.mxu1 %v6401_v23  ;;  %v6493_v22 = vld [vmem:[%s9186_s4 + $0x30] ss:$8 sps:$4 sm:$0xff]   ;;  %v6498_v23 = vld [vmem:[%s9186_s4 + $0x44] ss:$8 sps:$4 sm:$0xff]  }
  0xa4   : > { %1889 = vmatprep.subr.bf16.mxu0 %v6406_v24  ;;  %2053 = vmatprep.subr.bf16.mxu1 %v6409_v25  ;;  %v6496_v24 = vld [vmem:[%s9186_s4 + $0x40] ss:$8 sps:$4 sm:$0xff]   ;;  %v6501_v25 = vld [vmem:[%s9186_s4 + $0x54] ss:$8 sps:$4 sm:$0xff]  }
  0xa7   : > { %1890 = vmatpush1.bf16.msra.mxu0 %v6404_v26  ;;  %2054 = vmatpush1.bf16.msra.mxu1 %v6407_v27  ;;  %v6499_v26 = vld [vmem:[%s9186_s4 + $0x50] ss:$8 sps:$4 sm:$0xff]   ;;  %v6504_v27 = vld [vmem:[%s9186_s4 + $0x64] ss:$8 sps:$4 sm:$0xff]  }
  0xa8   : > { %1891 = vmatprep.subr.bf16.mxu0 %v6412_v28  ;;  %2055 = vmatprep.subr.bf16.mxu1 %v6415_v29  ;;  %v6502_v28 = vld [vmem:[%s9186_s4 + $0x60] ss:$8 sps:$4 sm:$0xff]   ;;  %v6507_v29 = vld [vmem:[%s9186_s4 + $0x74] ss:$8 sps:$4 sm:$0xff]  }
  0xab   : > { %1892 = vmatpush1.bf16.msra.mxu0 %v6410_v30  ;;  %2056 = vmatpush1.bf16.msra.mxu1 %v6413_v31  ;;  %v6505_v30 = vld [vmem:[%s9186_s4 + $0x70] ss:$8 sps:$4 sm:$0xff]   ;;  %v6510_v31 = vld [vmem:[%s9186_s4 + $0x84] ss:$8 sps:$4 sm:$0xff]  }
  0xac   : > { %1893 = vmatprep.subr.bf16.mxu0 %v6418_v32  ;;  %2057 = vmatprep.subr.bf16.mxu1 %v6421_v33  ;;  %v6508_v32 = vld [vmem:[%s9186_s4 + $0x80] ss:$8 sps:$4 sm:$0xff]   ;;  %v6513_v33 = vld [vmem:[%s9186_s4 + $0x94] ss:$8 sps:$4 sm:$0xff]  }
  0xaf   : > { %1894 = vmatpush1.bf16.msra.mxu0 %v6416_v34  ;;  %2058 = vmatpush1.bf16.msra.mxu1 %v6419_v35  ;;  %v6511_v34 = vld [vmem:[%s9186_s4 + $0x90] ss:$8 sps:$4 sm:$0xff]   ;;  %v6516_v35 = vld [vmem:[%s9186_s4 + $0xa4] ss:$8 sps:$4 sm:$0xff]  }
  0xb0   : > { %1895 = vmatprep.subr.bf16.mxu0 %v6424_v36  ;;  %2059 = vmatprep.subr.bf16.mxu1 %v6427_v37  ;;  %v6514_v36 = vld [vmem:[%s9186_s4 + $0xa0] ss:$8 sps:$4 sm:$0xff]   ;;  %v6519_v37 = vld [vmem:[%s9186_s4 + $0xb4] ss:$8 sps:$4 sm:$0xff]  }
  0xb3   : > { %1896 = vmatpush1.bf16.msra.mxu0 %v6422_v38  ;;  %2060 = vmatpush1.bf16.msra.mxu1 %v6425_v39  ;;  %v6517_v38 = vld [vmem:[%s9186_s4 + $0xb0] ss:$8 sps:$4 sm:$0xff]   ;;  %v6522_v39 = vld [vmem:[%s9186_s4 + $0xc4] ss:$8 sps:$4 sm:$0xff]  }
  0xb4   : > { %1897 = vmatprep.subr.bf16.mxu0 %v6430_v40  ;;  %2061 = vmatprep.subr.bf16.mxu1 %v6433_v41  ;;  %v6520_v40 = vld [vmem:[%s9186_s4 + $0xc0] ss:$8 sps:$4 sm:$0xff]   ;;  %v6525_v41 = vld [vmem:[%s9186_s4 + $0xd4] ss:$8 sps:$4 sm:$0xff]  }
  0xb7   : > { %1898 = vmatpush1.bf16.msra.mxu0 %v6428_v42  ;;  %2062 = vmatpush1.bf16.msra.mxu1 %v6431_v43  ;;  %v6523_v42 = vld [vmem:[%s9186_s4 + $0xd0] ss:$8 sps:$4 sm:$0xff]   ;;  %v6528_v43 = vld [vmem:[%s9186_s4 + $0xe4] ss:$8 sps:$4 sm:$0xff]  }
  0xb8   : > { %1899 = vmatprep.subr.bf16.mxu0 %v6436_v44  ;;  %2063 = vmatprep.subr.bf16.mxu1 %v6439_v45  ;;  %v6526_v44 = vld [vmem:[%s9186_s4 + $0xe0] ss:$8 sps:$4 sm:$0xff]   ;;  %v6531_v45 = vld [vmem:[%s9186_s4 + $0xf4] ss:$8 sps:$4 sm:$0xff]  }
  0xbb   : > { %1900 = vmatpush1.bf16.msra.mxu0 %v6434_v46  ;;  %2064 = vmatpush1.bf16.msra.mxu1 %v6437_v47  ;;  %v6529_v46 = vld [vmem:[%s9186_s4 + $0xf0] ss:$8 sps:$4 sm:$0xff]   ;;  %v6534_v47 = vld [vmem:[%s9186_s4 + $0x104] ss:$8 sps:$4 sm:$0xff]  }
  0xbc   : > { %1901 = vmatprep.subr.bf16.mxu0 %v6442_v48  ;;  %2065 = vmatprep.subr.bf16.mxu1 %v6445_v49  ;;  %v6580_v48 = vld [vmem:[%s9188_s6 + $0x40] sm:$0xff]  }
  0xbd   : > { %v6581_v49 = vld [vmem:[%s9188_s6] sm:$0xff]  }
  0xbf   : > { %1902 = vmatpush1.bf16.msra.mxu0 %v6440_v50  ;;  %2066 = vmatpush1.bf16.msra.mxu1 %v6443_v51  ;;  %v6582_v50 = vld [vmem:[%s9188_s6 + $0x48] sm:$0xff]  }
  0xc0   : > { %1903 = vmatprep.subr.bf16.mxu0 %v6448_v52  ;;  %2067 = vmatprep.subr.bf16.mxu1 %v6451_v53  ;;  %v6583_v51 = vld [vmem:[%s9188_s6 + $0x8] sm:$0xff]   ;;  %v6584_v52 = vld [vmem:[%s9188_s6 + $0x50] sm:$0xff]  }
  0xc1   : > { %v6585_v53 = vld [vmem:[%s9188_s6 + $0x10] sm:$0xff]  }
  0xc3   : > { %1904 = vmatpush1.bf16.msra.mxu0 %v6446_v54  ;;  %2068 = vmatpush1.bf16.msra.mxu1 %v6449_v55  ;;  %v6586_v54 = vld [vmem:[%s9188_s6 + $0x58] sm:$0xff]  }
  0xc4   : > { %1905 = vmatprep.subr.bf16.mxu0 %v6454_v56  ;;  %2069 = vmatprep.subr.bf16.mxu1 %v6457_v57  ;;  %v6587_v55 = vld [vmem:[%s9188_s6 + $0x18] sm:$0xff]   ;;  %v6588_v56 = vld [vmem:[%s9188_s6 + $0x60] sm:$0xff]  }
  0xc5   : > { %v6589_v57 = vld [vmem:[%s9188_s6 + $0x20] sm:$0xff]  }
  0xc7   : > { %1906 = vmatpush1.bf16.msra.mxu0 %v6452_v58  ;;  %2070 = vmatpush1.bf16.msra.mxu1 %v6455_v59  ;;  %v6590_v58 = vld [vmem:[%s9188_s6 + $0x68] sm:$0xff]  }
  0xc8   : > { %1907 = vmatprep.subr.bf16.mxu0 %v6460_v60  ;;  %2071 = vmatprep.subr.bf16.mxu1 %v6463_v61  ;;  %v6591_v59 = vld [vmem:[%s9188_s6 + $0x28] sm:$0xff]   ;;  %v6592_v60 = vld [vmem:[%s9188_s6 + $0x70] sm:$0xff]   ;;  %v771_v61 = vlaneseq }
  0xcb   : > { %1908 = vmatpush1.bf16.msra.mxu0 %v6458_v62  ;;  %2072 = vmatpush1.bf16.msra.mxu1 %v6461_v63  ;;  %v7993_v62 = vshrl.u32 %v771_v61, 7 }
  0xcc   : > { %1909 = vmatprep.subr.bf16.mxu0 %v6466_v0  ;;  %2073 = vmatprep.subr.bf16.mxu1 %v6469_v1  ;;  %v8001_v0 = vld [vmem:[%s9185_s3] sm:$0xf] }
  0xcd   : > { %v7996_v63 = vsub.s32 0, %v7993_v62  ;;  %v8004_v1 = vsub.s32 1, %v7993_v62 }
  0xcf   : > { %1910 = vmatpush1.bf16.msra.mxu0 %v6464_v2  ;;  %2074 = vmatpush1.bf16.msra.mxu1 %v6467_v3  ;;  %v8007_v2 = vsub.s32 3, %v7993_v62  ;;  %v774_v3 = vrot.slane %v8001_v0, %v7996_v63 }
  0xd0   : > { %1911 = vmatprep.subr.bf16.mxu0 %v6472_v4  ;;  %2075 = vmatprep.subr.bf16.mxu1 %v6475_v5  ;;  %v778_v4 = vrot.slane %v8001_v0, %v8004_v1 }
  0xd1   : > { %v786_v5 = vrot.slane %v8001_v0, %v8007_v2 }
  0xd3   : > { %1912 = vmatpush1.bf16.msra.mxu0 %v6470_v6  ;;  %2076 = vmatpush1.bf16.msra.mxu1 %v6473_v7 }
  0xd4   : > { %1922 = vmatprep.subr.bf16.mxu0 %v6480_v8  ;;  %2086 = vmatprep.subr.bf16.mxu1 %v6483_v9 }
  0xd6   : > { %1914 = vmatmul.mubr.bf16.vlgmr.msra.gmra.mrb[0].mxu0 %v5423_v13  ;;  %2078 = vmatmul.mubr.bf16.vlgmr.msra.gmra.mrb[0].mxu1 %v5423_v13 }
  0xd7   : > { %1923 = vmatpush1.bf16.msra.mxu0 %v6478_v10  ;;  %2087 = vmatpush1.bf16.msra.mxu1 %v6481_v11 }
  0xd8   : > { %1954 = vmatprep.mubr.bf16.mxu0 %v7100_v15  ;;  %2118 = vmatprep.mubr.bf16.mxu1 %v7100_v15 }
  0xd9   : > { %2527 = vmatprep.subr.bf16.mxu0 %v6486_v14  ;;  %6021 = vmatprep.subr.bf16.mxu1 %v6580_v48  ;;  %v8099_v48 = vsub.s32 2, %v7993_v62 }
  0xe2   : > { %5622 = vmatmul.mubr.msk.bf16.vlgmr.msra.gmra.mrb[0].mxu0 %vm1795_vm0, %v6281_v16  ;;  %5623 = vmatmul.mubr.msk.bf16.vlgmr.msra.gmra.mrb[0].mxu1 %vm1795_vm0, %v6281_v16 }
  0xe3   : > { %2528 = vmatpush1.bf16.msra.mxu0 %v6484_v12  ;;  %6022 = vmatpush3.bf16.msra.mxu1 %v6581_v49  ;;  %v6576_v49 = vld [vmem:[%s9186_s4 + $0x1e4] ss:$8 sps:$4 sm:$0xff]  }
  0xe4   : > { %2529 = vmatprep.subr.bf16.mxu0 %v6489_v17  ;;  %6023 = vmatprep.subr.bf16.mxu1 %v6582_v50  ;;  %v6574_v50 = vld [vmem:[%s9186_s4 + $0x1e0] ss:$8 sps:$4 sm:$0xff]  }
  0xe7   : > { %2530 = vmatpush1.bf16.msra.mxu0 %v6487_v18  ;;  %6024 = vmatpush3.bf16.msra.mxu1 %v6583_v51  ;;  %v782_v51 = vrot.slane %v8001_v0, %v8099_v48 }
  0xe8   : > { %2531 = vmatprep.subr.bf16.mxu0 %v6492_v19  ;;  %6025 = vmatprep.subr.bf16.mxu1 %v6584_v52  ;;  %v6532_v19 = vld [vmem:[%s9186_s4 + $0x100] ss:$8 sps:$4 sm:$0xff]   ;;  %v6579_v52 = vld [vmem:[%s9186_s4 + $0x1f4] ss:$8 sps:$4 sm:$0xff]  }
  0xeb   : > { %2532 = vmatpush1.bf16.msra.mxu0 %v6490_v20  ;;  %6026 = vmatpush3.bf16.msra.mxu1 %v6585_v53  ;;  %v6577_v53 = vld [vmem:[%s9186_s4 + $0x1f0] ss:$8 sps:$4 sm:$0xff]  }
  0xec   : > { %2533 = vmatprep.subr.bf16.mxu0 %v6495_v21  ;;  %6027 = vmatprep.subr.bf16.mxu1 %v6586_v54  ;;  %v6537_v21 = vld [vmem:[%s9186_s4 + $0x114] ss:$8 sps:$4 sm:$0xff]  }
  0xef   : > { %2534 = vmatpush1.bf16.msra.mxu0 %v6493_v22  ;;  %6028 = vmatpush3.bf16.msra.mxu1 %v6587_v55 }
  0xf0   : > { %2535 = vmatprep.subr.bf16.mxu0 %v6498_v23  ;;  %6029 = vmatprep.subr.bf16.mxu1 %v6588_v56  ;;  %v6535_v23 = vld [vmem:[%s9186_s4 + $0x110] ss:$8 sps:$4 sm:$0xff]  }
  0xf1   : > { %v6593_v56 = vld [vmem:[%s9188_s6 + $0x30] sm:$0xff]  }
  0xf3   : > { %2536 = vmatpush1.bf16.msra.mxu0 %v6496_v24  ;;  %6030 = vmatpush3.bf16.msra.mxu1 %v6589_v57  ;;  %v6540_v24 = vld [vmem:[%s9186_s4 + $0x124] ss:$8 sps:$4 sm:$0xff]   ;;  %v6594_v57 = vld [vmem:[%s9188_s6 + $0x78] sm:$0xff]  }
  0xf4   : > { %2537 = vmatprep.subr.bf16.mxu0 %v6501_v25  ;;  %6031 = vmatprep.subr.bf16.mxu1 %v6590_v58  ;;  %v6538_v25 = vld [vmem:[%s9186_s4 + $0x120] ss:$8 sps:$4 sm:$0xff]   ;;  %v6595_v58 = vld [vmem:[%s9188_s6 + $0x38] sm:$0xff]  }
  0xf7   : > { %2538 = vmatpush1.bf16.msra.mxu0 %v6499_v26  ;;  %6032 = vmatpush3.bf16.msra.mxu1 %v6591_v59  ;;  %v6543_v26 = vld [vmem:[%s9186_s4 + $0x134] ss:$8 sps:$4 sm:$0xff]   ;;  %v6598_v59 = vld [vmem:[%s9190_s8 + $0x4] ss:$8 sps:$4 sm:$0xff]  }
  0xf8   : > { %2539 = vmatprep.subr.bf16.mxu0 %v6504_v27  ;;  %6033 = vmatprep.subr.bf16.mxu1 %v6592_v60  ;;  %v6541_v27 = vld [vmem:[%s9186_s4 + $0x130] ss:$8 sps:$4 sm:$0xff]   ;;  %v2195_v60 = vld [vmem:[%s9187_s5] sm:$0x3] }
  0xf9   : > { %v2200_v61 = vrot.slane %v2195_v60, %v7996_v63  ;;  %v2204_v0 = vrot.slane %v2195_v60, %v8004_v1 }
  0xfb   : > { %2540 = vmatpush1.bf16.msra.mxu0 %v6502_v28  ;;  %v6546_v28 = vld [vmem:[%s9186_s4 + $0x144] ss:$8 sps:$4 sm:$0xff]   ;;  %6034 = vmatpush3.bf16.msra.mxu1 %v6593_v56 }
  0xfc   : > { %2541 = vmatprep.subr.bf16.mxu0 %v6507_v29  ;;  %v6544_v29 = vld [vmem:[%s9186_s4 + $0x140] ss:$8 sps:$4 sm:$0xff]   ;;  %6035 = vmatprep.subr.bf16.mxu1 %v6594_v57  ;;  %v6709_v56 = vld [vmem:[%s9192_s10 + $0x1cc] ss:$16 sps:$4 sm:$0xff]  }
  0xfd   : > { %v6707_v57 = vld [vmem:[%s9192_s10 + $0x1c8] ss:$16 sps:$4 sm:$0xff]  }
  0xff   : > { %2542 = vmatpush1.bf16.msra.mxu0 %v6505_v30  ;;  %v6549_v30 = vld [vmem:[%s9186_s4 + $0x154] ss:$8 sps:$4 sm:$0xff]   ;;  %6036 = vmatpush3.bf16.msra.mxu1 %v6595_v58 }
 0x100   : > { %2543 = vmatprep.subr.bf16.mxu0 %v6510_v31  ;;  %v6547_v31 = vld [vmem:[%s9186_s4 + $0x150] ss:$8 sps:$4 sm:$0xff]   ;;  %2895 = vmatprep.subr.bf16.mxu1 %v6598_v59  ;;  %v5688_v59 = vld [vmem:[%s9189_s7] ss:$0 sm:$0xff] }
 0x103   : > { %2544 = vmatpush1.bf16.msra.mxu0 %v6508_v32  ;;  %v6552_v32 = vld [vmem:[%s9186_s4 + $0x164] ss:$8 sps:$4 sm:$0xff]  }
 0x104   : > { %2545 = vmatprep.subr.bf16.mxu0 %v6513_v33  ;;  %v6550_v33 = vld [vmem:[%s9186_s4 + $0x160] ss:$8 sps:$4 sm:$0xff]  }
 0x107   : > { %2546 = vmatpush1.bf16.msra.mxu0 %v6511_v34  ;;  %v6555_v34 = vld [vmem:[%s9186_s4 + $0x174] ss:$8 sps:$4 sm:$0xff]  }
 0x108   : > { %2547 = vmatprep.subr.bf16.mxu0 %v6516_v35  ;;  %v6553_v35 = vld [vmem:[%s9186_s4 + $0x170] ss:$8 sps:$4 sm:$0xff]  }
 0x10b   : > { %2548 = vmatpush1.bf16.msra.mxu0 %v6514_v36  ;;  %v6558_v36 = vld [vmem:[%s9186_s4 + $0x184] ss:$8 sps:$4 sm:$0xff]  }
 0x10c   : > { %2549 = vmatprep.subr.bf16.mxu0 %v6519_v37  ;;  %v6556_v37 = vld [vmem:[%s9186_s4 + $0x180] ss:$8 sps:$4 sm:$0xff]  }
 0x10f   : > { %2550 = vmatpush1.bf16.msra.mxu0 %v6517_v38  ;;  %v6561_v38 = vld [vmem:[%s9186_s4 + $0x194] ss:$8 sps:$4 sm:$0xff]  }
 0x110   : > { %2551 = vmatprep.subr.bf16.mxu0 %v6522_v39  ;;  %v6559_v39 = vld [vmem:[%s9186_s4 + $0x190] ss:$8 sps:$4 sm:$0xff]  }
 0x113   : > { %2552 = vmatpush1.bf16.msra.mxu0 %v6520_v40  ;;  %v6564_v40 = vld [vmem:[%s9186_s4 + $0x1a4] ss:$8 sps:$4 sm:$0xff]  }
 0x114   : > { %2553 = vmatprep.subr.bf16.mxu0 %v6525_v41  ;;  %v6562_v41 = vld [vmem:[%s9186_s4 + $0x1a0] ss:$8 sps:$4 sm:$0xff]  }
 0x117   : > { %2554 = vmatpush1.bf16.msra.mxu0 %v6523_v42  ;;  %v6567_v42 = vld [vmem:[%s9186_s4 + $0x1b4] ss:$8 sps:$4 sm:$0xff]  }
 0x118   : > { %2555 = vmatprep.subr.bf16.mxu0 %v6528_v43  ;;  %v6565_v43 = vld [vmem:[%s9186_s4 + $0x1b0] ss:$8 sps:$4 sm:$0xff]  }
 0x11b   : > { %2556 = vmatpush1.bf16.msra.mxu0 %v6526_v44  ;;  %v6570_v44 = vld [vmem:[%s9186_s4 + $0x1c4] ss:$8 sps:$4 sm:$0xff]  }
 0x11c   : > { %2557 = vmatprep.subr.bf16.mxu0 %v6531_v45  ;;  %v6568_v45 = vld [vmem:[%s9186_s4 + $0x1c0] ss:$8 sps:$4 sm:$0xff]  }
 0x11f   : > { %2558 = vmatpush1.bf16.msra.mxu0 %v6529_v46  ;;  %v6573_v46 = vld [vmem:[%s9186_s4 + $0x1d4] ss:$8 sps:$4 sm:$0xff]  }
 0x120   : > { %2568 = vmatprep.subr.bf16.mxu0 %v6534_v47  ;;  %v6571_v47 = vld [vmem:[%s9186_s4 + $0x1d0] ss:$8 sps:$4 sm:$0xff]  }
 0x1b5   : > { %v1956_v6 = vpop.f32.mrb[0].mxu0  ;;  %v8015_v7 = vpop.f32.mrb[0].mxu1 }
 0x1b6   : > { %v6087_v8 = vadd.f32 %v1956_v6, %v774_v3  ;;  %v1958_v9 = vpop.f32.mrb[1].mxu0  ;;  %v2122_v10 = vpop.f32.mrb[1].mxu1  ;;  %v6089_v54 = vadd.f32 %v8015_v7, %v782_v51  ;;  %v6689_v51 = vld [vmem:[%s9192_s10 + $0x168] ss:$16 sps:$4 sm:$0xff]  }
 0x1b7   : > { %v6088_v11 = vadd.f32 %v1958_v9, %v778_v4  ;;  %v6090_v13 = vadd.f32 %v2122_v10, %v786_v5  ;;  %v1960_v14 = vpop.f32.mrb[2].mxu0  ;;  %v2124_v16 = vpop.f32.mrb[2].mxu1  ;;  %v6596_v10 = vld [vmem:[%s9190_s8] ss:$8 sps:$4 sm:$0xff]  }
 0x1b8   : > { %v1961_v12 = vpop.f32.mrb[3].mxu0  ;;  %v2125_v17 = vpop.f32.mrb[3].mxu1  ;;  %v2127_v20 = vpack.c.bf16 %v6087_v8, %v6087_v8  ;;  %v2129_v55 = vpack.c.bf16 %v6089_v54, %v6089_v54  ;;  %v6599_v14 = vld [vmem:[%s9190_s8 + $0x10] ss:$8 sps:$4 sm:$0xff]   ;;  %v6604_v16 = vld [vmem:[%s9190_s8 + $0x24] ss:$8 sps:$4 sm:$0xff]  }
 0x1b9   : > { %v2128_v18 = vpack.c.bf16 %v6088_v11, %v6088_v11  ;;  %v2130_v22 = vpack.c.bf16 %v6090_v13, %v6090_v13  ;;  %v6601_v13 = vld [vmem:[%s9190_s8 + $0x14] ss:$8 sps:$4 sm:$0xff]   ;;  %v6602_v12 = vld [vmem:[%s9190_s8 + $0x20] ss:$8 sps:$4 sm:$0xff]  }
 0x1ba   : > { %v6607_v17 = vld [vmem:[%s9190_s8 + $0x34] ss:$8 sps:$4 sm:$0xff]  }
 0x1bb   : > { %2559 = vmatprep.mubr.bf16.mxu0 %v2128_v18  ;;  %v6610_v18 = vld [vmem:[%s9190_s8 + $0x44] ss:$8 sps:$4 sm:$0xff]  }
 0x1bc   : > { %2560 = vmatmul.mubr.bf16.vlgmr.msra.gmra.mrb[4].mxu0 %v2127_v20  ;;  %v6613_v20 = vld [vmem:[%s9190_s8 + $0x54] ss:$8 sps:$4 sm:$0xff]  }
 0x1bd   : > { %2569 = vmatpush1.bf16.msra.mxu0 %v6532_v19  ;;  %2600 = vmatprep.mubr.bf16.mxu0 %v2130_v22  ;;  %v6608_v19 = vld [vmem:[%s9190_s8 + $0x40] ss:$8 sps:$4 sm:$0xff]   ;;  %v6616_v22 = vld [vmem:[%s9190_s8 + $0x64] ss:$8 sps:$4 sm:$0xff]  }
 0x1be   : > { %2570 = vmatprep.subr.bf16.mxu0 %v6537_v21  ;;  %v6611_v21 = vld [vmem:[%s9190_s8 + $0x50] ss:$8 sps:$4 sm:$0xff]   ;;  %v6703_v54 = vld [vmem:[%s9192_s10 + $0x1ac] ss:$16 sps:$4 sm:$0xff]  }
 0x1c1   : > { %2571 = vmatpush1.bf16.msra.mxu0 %v6535_v23  ;;  %v6614_v23 = vld [vmem:[%s9190_s8 + $0x60] ss:$8 sps:$4 sm:$0xff]  }
 0x1c2   : > { %2572 = vmatprep.subr.bf16.mxu0 %v6540_v24  ;;  %v6619_v24 = vld [vmem:[%s9190_s8 + $0x74] ss:$8 sps:$4 sm:$0xff]  }
 0x1c5   : > { %2573 = vmatpush1.bf16.msra.mxu0 %v6538_v25  ;;  %v6617_v25 = vld [vmem:[%s9190_s8 + $0x70] ss:$8 sps:$4 sm:$0xff]  }
 0x1c6   : > { %2574 = vmatprep.subr.bf16.mxu0 %v6543_v26  ;;  %v6622_v26 = vld [vmem:[%s9192_s10 + $0x4] ss:$16 sps:$4 sm:$0xff]  }
 0x1c9   : > { %2575 = vmatpush1.bf16.msra.mxu0 %v6541_v27  ;;  %v6623_v27 = vld [vmem:[%s9192_s10 + $0x8] ss:$16 sps:$4 sm:$0xff]  }
 0x1ca   : > { %2576 = vmatprep.subr.bf16.mxu0 %v6546_v28  ;;  %v6625_v28 = vld [vmem:[%s9192_s10 + $0xc] ss:$16 sps:$4 sm:$0xff]  }
 0x1cd   : > { %2577 = vmatpush1.bf16.msra.mxu0 %v6544_v29  ;;  %v6631_v29 = vld [vmem:[%s9192_s10 + $0x2c] ss:$16 sps:$4 sm:$0xff]  }
 0x1ce   : > { %2578 = vmatprep.subr.bf16.mxu0 %v6549_v30  ;;  %v6629_v30 = vld [vmem:[%s9192_s10 + $0x28] ss:$16 sps:$4 sm:$0xff]  }
 0x1d1   : > { %2579 = vmatpush1.bf16.msra.mxu0 %v6547_v31  ;;  %v6637_v31 = vld [vmem:[%s9192_s10 + $0x4c] ss:$16 sps:$4 sm:$0xff]  }
 0x1d2   : > { %2580 = vmatprep.subr.bf16.mxu0 %v6552_v32  ;;  %v6635_v32 = vld [vmem:[%s9192_s10 + $0x48] ss:$16 sps:$4 sm:$0xff]  }
 0x1d5   : > { %2581 = vmatpush1.bf16.msra.mxu0 %v6550_v33  ;;  %v6643_v33 = vld [vmem:[%s9192_s10 + $0x6c] ss:$16 sps:$4 sm:$0xff]  }
 0x1d6   : > { %2582 = vmatprep.subr.bf16.mxu0 %v6555_v34  ;;  %v6641_v34 = vld [vmem:[%s9192_s10 + $0x68] ss:$16 sps:$4 sm:$0xff]  }
 0x1d9   : > { %2583 = vmatpush1.bf16.msra.mxu0 %v6553_v35  ;;  %v6649_v35 = vld [vmem:[%s9192_s10 + $0x8c] ss:$16 sps:$4 sm:$0xff]  }
 0x1da   : > { %2584 = vmatprep.subr.bf16.mxu0 %v6558_v36  ;;  %v6647_v36 = vld [vmem:[%s9192_s10 + $0x88] ss:$16 sps:$4 sm:$0xff]  }
 0x1dd   : > { %2585 = vmatpush1.bf16.msra.mxu0 %v6556_v37  ;;  %v6655_v37 = vld [vmem:[%s9192_s10 + $0xac] ss:$16 sps:$4 sm:$0xff]  }
 0x1de   : > { %2586 = vmatprep.subr.bf16.mxu0 %v6561_v38  ;;  %v6653_v38 = vld [vmem:[%s9192_s10 + $0xa8] ss:$16 sps:$4 sm:$0xff]  }
 0x1e1   : > { %2587 = vmatpush1.bf16.msra.mxu0 %v6559_v39  ;;  %v6661_v39 = vld [vmem:[%s9192_s10 + $0xcc] ss:$16 sps:$4 sm:$0xff]  }
 0x1e2   : > { %2588 = vmatprep.subr.bf16.mxu0 %v6564_v40  ;;  %v6659_v40 = vld [vmem:[%s9192_s10 + $0xc8] ss:$16 sps:$4 sm:$0xff]  }
 0x1e5   : > { %2589 = vmatpush1.bf16.msra.mxu0 %v6562_v41  ;;  %v6667_v41 = vld [vmem:[%s9192_s10 + $0xec] ss:$16 sps:$4 sm:$0xff]  }
 0x1e6   : > { %2590 = vmatprep.subr.bf16.mxu0 %v6567_v42  ;;  %v6665_v42 = vld [vmem:[%s9192_s10 + $0xe8] ss:$16 sps:$4 sm:$0xff]  }
 0x1e9   : > { %2591 = vmatpush1.bf16.msra.mxu0 %v6565_v43  ;;  %v6673_v43 = vld [vmem:[%s9192_s10 + $0x10c] ss:$16 sps:$4 sm:$0xff]  }
 0x1ea   : > { %2592 = vmatprep.subr.bf16.mxu0 %v6570_v44  ;;  %v6671_v44 = vld [vmem:[%s9192_s10 + $0x108] ss:$16 sps:$4 sm:$0xff]  }
 0x1ed   : > { %2593 = vmatpush1.bf16.msra.mxu0 %v6568_v45  ;;  %v6679_v45 = vld [vmem:[%s9192_s10 + $0x12c] ss:$16 sps:$4 sm:$0xff]  }
 0x1ee   : > { %2594 = vmatprep.subr.bf16.mxu0 %v6573_v46  ;;  %v6677_v46 = vld [vmem:[%s9192_s10 + $0x128] ss:$16 sps:$4 sm:$0xff]  }
 0x1f1   : > { %2595 = vmatpush1.bf16.msra.mxu0 %v6571_v47  ;;  %v6685_v47 = vld [vmem:[%s9192_s10 + $0x14c] ss:$16 sps:$4 sm:$0xff]  }
 0x1f2   : > { %2596 = vmatprep.subr.bf16.mxu0 %v6576_v49  ;;  %v6683_v49 = vld [vmem:[%s9192_s10 + $0x148] ss:$16 sps:$4 sm:$0xff]  }
 0x1f5   : > { %2597 = vmatpush1.bf16.msra.mxu0 %v6574_v50  ;;  %v6691_v50 = vld [vmem:[%s9192_s10 + $0x16c] ss:$16 sps:$4 sm:$0xff]  }
 0x1f6   : > { %2598 = vmatprep.subr.bf16.mxu0 %v6579_v52  ;;  %v6697_v52 = vld [vmem:[%s9192_s10 + $0x18c] ss:$16 sps:$4 sm:$0xff]  }
 0x1f9   : > { %2599 = vmatpush1.bf16.msra.mxu0 %v6577_v53  ;;  %v6695_v53 = vld [vmem:[%s9192_s10 + $0x188] ss:$16 sps:$4 sm:$0xff]  }
 0x1fa   : > { %3385 = vmatprep.subr.bf16.mxu0 %v6625_v28  ;;  %v6686_v28 = vld [vmem:[%s9192_s10 + $0x160] ss:$16 sps:$4 sm:$0xff]  }
 0x1fc   : > { %2601 = vmatmul.mubr.bf16.vlgmr.msra.gmra.mrb[4].mxu0 %v2129_v55  ;;  %v6701_v55 = vld [vmem:[%s9192_s10 + $0x1a8] ss:$16 sps:$4 sm:$0xff]  }
 0x1fd   : > { %3386 = vmatpush1.bf16.msra.mxu0 %v6623_v27  ;;  %v6688_v27 = vld [vmem:[%s9192_s10 + $0x164] ss:$16 sps:$4 sm:$0xff]  }
 0x1fe   : > { %3387 = vmatprep.subr.bf16.mxu0 %v6631_v29  ;;  %v6694_v29 = vld [vmem:[%s9192_s10 + $0x184] ss:$16 sps:$4 sm:$0xff]  }
 0x201   : > { %3388 = vmatpush1.bf16.msra.mxu0 %v6629_v30  ;;  %v6692_v30 = vld [vmem:[%s9192_s10 + $0x180] ss:$16 sps:$4 sm:$0xff]  }
 0x202   : > { %3389 = vmatprep.subr.bf16.mxu0 %v6637_v31  ;;  %v6700_v31 = vld [vmem:[%s9192_s10 + $0x1a4] ss:$16 sps:$4 sm:$0xff]  }
 0x205   : > { %3390 = vmatpush1.bf16.msra.mxu0 %v6635_v32  ;;  %v6698_v32 = vld [vmem:[%s9192_s10 + $0x1a0] ss:$16 sps:$4 sm:$0xff]  }
 0x206   : > { %3391 = vmatprep.subr.bf16.mxu0 %v6643_v33  ;;  %v6706_v33 = vld [vmem:[%s9192_s10 + $0x1c4] ss:$16 sps:$4 sm:$0xff]  }
 0x209   : > { %3392 = vmatpush1.bf16.msra.mxu0 %v6641_v34  ;;  %v6704_v34 = vld [vmem:[%s9192_s10 + $0x1c0] ss:$16 sps:$4 sm:$0xff]  }
 0x20a   : > { %3393 = vmatprep.subr.bf16.mxu0 %v6649_v35  ;;  %v6712_v35 = vld [vmem:[%s9192_s10 + $0x1e4] ss:$16 sps:$4 sm:$0xff]  }
 0x20d   : > { %3394 = vmatpush1.bf16.msra.mxu0 %v6647_v36  ;;  %v6715_v36 = vld [vmem:[%s9192_s10 + $0x1ec] ss:$16 sps:$4 sm:$0xff]  }
 0x20e   : > { %3395 = vmatprep.subr.bf16.mxu0 %v6655_v37  ;;  %v6710_v37 = vld [vmem:[%s9192_s10 + $0x1e0] ss:$16 sps:$4 sm:$0xff]  }
 0x211   : > { %3396 = vmatpush1.bf16.msra.mxu0 %v6653_v38  ;;  %v6713_v38 = vld [vmem:[%s9192_s10 + $0x1e8] ss:$16 sps:$4 sm:$0xff]  }
 0x212   : > { %3397 = vmatprep.subr.bf16.mxu0 %v6661_v39  ;;  %v6718_v39 = vld [vmem:[%s9194_s12 + $0x4] ss:$28 sps:$4 sm:$0xff]  }
 0x215   : > { %3398 = vmatpush1.bf16.msra.mxu0 %v6659_v40  ;;  %v6721_v40 = vld [vmem:[%s9194_s12 + $0xc] ss:$28 sps:$4 sm:$0xff]  }
 0x216   : > { %3399 = vmatprep.subr.bf16.mxu0 %v6667_v41  ;;  %v2803_v41 = vld [vmem:[%s9191_s9] sm:$0x3] }
 0x219   : > { %3400 = vmatpush1.bf16.msra.mxu0 %v6665_v42  ;;  %v2808_v42 = vrot.slane %v2803_v41, %v7996_v63 }
 0x21a   : > { %3401 = vmatprep.subr.bf16.mxu0 %v6673_v43  ;;  %v2812_v43 = vrot.slane %v2803_v41, %v8004_v1  ;;  %v6788_v41 = vld [vmem:[%s9194_s12 + $0x2a0] ss:$28 sps:$4 sm:$0xff]  }
 0x21d   : > { %3402 = vmatpush1.bf16.msra.mxu0 %v6671_v44 }
 0x21e   : > { %3403 = vmatprep.subr.bf16.mxu0 %v6679_v45 }
 0x221   : > { %3404 = vmatpush1.bf16.msra.mxu0 %v6677_v46 }
 0x222   : > { %3405 = vmatprep.subr.bf16.mxu0 %v6685_v47 }
 0x225   : > { %3406 = vmatpush1.bf16.msra.mxu0 %v6683_v49 }
 0x226   : > { %3407 = vmatprep.subr.bf16.mxu0 %v6691_v50 }
 0x229   : > { %3408 = vmatpush1.bf16.msra.mxu0 %v6689_v51 }
 0x22a   : > { %3409 = vmatprep.subr.bf16.mxu0 %v6697_v52  ;;  %v6716_v52 = vld [vmem:[%s9194_s12] ss:$28 sps:$4 sm:$0xff]  }
 0x22d   : > { %3410 = vmatpush1.bf16.msra.mxu0 %v6695_v53  ;;  %v6719_v53 = vld [vmem:[%s9194_s12 + $0x8] ss:$28 sps:$4 sm:$0xff]  }
 0x22e   : > { %3411 = vmatprep.subr.bf16.mxu0 %v6703_v54 }
 0x231   : > { %3412 = vmatpush1.bf16.msra.mxu0 %v6701_v55  ;;  %v6724_v55 = vld [vmem:[%s9194_s12 + $0x3c] ss:$28 sps:$4 sm:$0xff]  }
 0x232   : > { %3413 = vmatprep.subr.bf16.mxu0 %v6709_v56  ;;  %v6727_v56 = vld [vmem:[%s9194_s12 + $0x44] ss:$28 sps:$4 sm:$0xff]  }
 0x235   : > { %3414 = vmatpush1.bf16.msra.mxu0 %v6707_v57  ;;  %v6722_v57 = vld [vmem:[%s9194_s12 + $0x38] ss:$28 sps:$4 sm:$0xff]  }
 0x236   : > { %3415 = vmatprep.subr.bf16.mxu0 %v6715_v36  ;;  %v6787_v36 = vld [vmem:[%s9194_s12 + $0x274] ss:$28 sps:$4 sm:$0xff]  }
 0x239   : > { %3416 = vmatpush1.bf16.msra.mxu0 %v6713_v38  ;;  %v6785_v38 = vld [vmem:[%s9194_s12 + $0x270] ss:$28 sps:$4 sm:$0xff]  }
 0x23a   : > { %4957 = vmatprep.subr.bf16.mxu0 %v6721_v40  ;;  %v6793_v40 = vld [vmem:[%s9194_s12 + $0x2ac] ss:$28 sps:$4 sm:$0xff]  }
 0x2cf   : > { %v2602_v3 = vpop.f32.mrb[4].mxu0 }
 0x2d0   : > { %v6091_v4 = vadd.f32 %v2602_v3, %v2200_v61  ;;  %v2604_v5 = vpop.f32.mrb[5].mxu0 }
 0x2d1   : > { %v6092_v6 = vadd.f32 %v2604_v5, %v2204_v0  ;;  %v2606_v7 = vpop.f32.mrb[6].mxu0  ;;  %v6620_v5 = vld [vmem:[%s9192_s10] ss:$16 sps:$4 sm:$0xff]  }
 0x2d2   : > { %v2607_v8 = vpop.f32.mrb[7].mxu0  ;;  %v2609_v11 = vpack.c.bf16 %v6091_v4, %v6091_v4  ;;  %v6628_v7 = vld [vmem:[%s9192_s10 + $0x24] ss:$16 sps:$4 sm:$0xff]  }
 0x2d3   : > { %v2610_v9 = vpack.c.bf16 %v6092_v6, %v6092_v6  ;;  %v6626_v8 = vld [vmem:[%s9192_s10 + $0x20] ss:$16 sps:$4 sm:$0xff]  }
 0x2d5   : > { %2778 = vmatprep.mubr.bf16.mxu1 %v2610_v9  ;;  %v6634_v9 = vld [vmem:[%s9192_s10 + $0x44] ss:$16 sps:$4 sm:$0xff]  }
 0x2d6   : > { %2779 = vmatmul.mubr.bf16.vlgmr.msra.gmra.mrb[4].mxu1 %v2609_v11  ;;  %v6640_v11 = vld [vmem:[%s9192_s10 + $0x64] ss:$16 sps:$4 sm:$0xff]  }
 0x2d7   : > { %2896 = vmatpush1.bf16.msra.mxu1 %v6596_v10  ;;  %2927 = vmatprep.mubr.bf16.mxu1 %v7100_v15  ;;  %v6605_v15 = vld [vmem:[%s9190_s8 + $0x30] ss:$8 sps:$4 sm:$0xff]  }
 0x2d8   : > { %2897 = vmatprep.subr.bf16.mxu1 %v6601_v13  ;;  %v6632_v10 = vld [vmem:[%s9192_s10 + $0x40] ss:$16 sps:$4 sm:$0xff]  }
 0x2d9   : > { %v6638_v13 = vld [vmem:[%s9192_s10 + $0x60] ss:$16 sps:$4 sm:$0xff]  }
 0x2db   : > { %2898 = vmatpush1.bf16.msra.mxu1 %v6599_v14  ;;  %v6646_v14 = vld [vmem:[%s9192_s10 + $0x84] ss:$16 sps:$4 sm:$0xff]  }
 0x2dc   : > { %2899 = vmatprep.subr.bf16.mxu1 %v6604_v16  ;;  %v6644_v16 = vld [vmem:[%s9192_s10 + $0x80] ss:$16 sps:$4 sm:$0xff]  }
 0x2df   : > { %2900 = vmatpush1.bf16.msra.mxu1 %v6602_v12  ;;  %v6652_v12 = vld [vmem:[%s9192_s10 + $0xa4] ss:$16 sps:$4 sm:$0xff]  }
 0x2e0   : > { %2901 = vmatprep.subr.bf16.mxu1 %v6607_v17  ;;  %v6650_v17 = vld [vmem:[%s9192_s10 + $0xa0] ss:$16 sps:$4 sm:$0xff]  }
 0x2e3   : > { %2902 = vmatpush1.bf16.msra.mxu1 %v6605_v15  ;;  %v6658_v15 = vld [vmem:[%s9192_s10 + $0xc4] ss:$16 sps:$4 sm:$0xff]  }
 0x2e4   : > { %2903 = vmatprep.subr.bf16.mxu1 %v6610_v18  ;;  %v6656_v18 = vld [vmem:[%s9192_s10 + $0xc0] ss:$16 sps:$4 sm:$0xff]  }
 0x2e7   : > { %2904 = vmatpush1.bf16.msra.mxu1 %v6608_v19  ;;  %v6664_v19 = vld [vmem:[%s9192_s10 + $0xe4] ss:$16 sps:$4 sm:$0xff]  }
 0x2e8   : > { %2905 = vmatprep.subr.bf16.mxu1 %v6613_v20  ;;  %v6662_v20 = vld [vmem:[%s9192_s10 + $0xe0] ss:$16 sps:$4 sm:$0xff]  }
 0x2eb   : > { %2906 = vmatpush1.bf16.msra.mxu1 %v6611_v21  ;;  %v6670_v21 = vld [vmem:[%s9192_s10 + $0x104] ss:$16 sps:$4 sm:$0xff]  }
 0x2ec   : > { %2907 = vmatprep.subr.bf16.mxu1 %v6616_v22  ;;  %v6668_v22 = vld [vmem:[%s9192_s10 + $0x100] ss:$16 sps:$4 sm:$0xff]  }
 0x2ef   : > { %2908 = vmatpush1.bf16.msra.mxu1 %v6614_v23  ;;  %v6676_v23 = vld [vmem:[%s9192_s10 + $0x124] ss:$16 sps:$4 sm:$0xff]  }
 0x2f0   : > { %2909 = vmatprep.subr.bf16.mxu1 %v6619_v24  ;;  %v6674_v24 = vld [vmem:[%s9192_s10 + $0x120] ss:$16 sps:$4 sm:$0xff]  }
 0x2f3   : > { %2910 = vmatpush1.bf16.msra.mxu1 %v6617_v25  ;;  %v6682_v25 = vld [vmem:[%s9192_s10 + $0x144] ss:$16 sps:$4 sm:$0xff]  }
 0x2f4   : > { %3344 = vmatprep.subr.bf16.mxu1 %v6622_v26  ;;  %v6680_v26 = vld [vmem:[%s9192_s10 + $0x140] ss:$16 sps:$4 sm:$0xff]  }
 0x3a9   : > { %v6037_v58 = vpop.f32.mrb[4].mxu1 }
 0x3aa   : > { %v6038_v60 = vpop.f32.mrb[5].mxu1 }
 0x3ab   : > { %v6039_v61 = vadd.f32 %v6038_v60, %v6037_v58  ;;  %v6040_v0 = vpop.f32.mrb[6].mxu1  ;;  %v6725_v58 = vld [vmem:[%s9194_s12 + $0x40] ss:$28 sps:$4 sm:$0xff]  }
 0x3ac   : > { %v6041_v3 = vpop.f32.mrb[7].mxu1  ;;  %v6733_v60 = vld [vmem:[%s9194_s12 + $0x7c] ss:$28 sps:$4 sm:$0xff]  }
 0x3ad   : > { %v2781_v4 = vadd.f32 %v6039_v61, %v5688_v59  ;;  %v6730_v59 = vld [vmem:[%s9194_s12 + $0x74] ss:$28 sps:$4 sm:$0xff]   ;;  %v6736_v3 = vld [vmem:[%s9194_s12 + $0xac] ss:$28 sps:$4 sm:$0xff]  }
 0x3ae   : > { %v6728_v61 = vld [vmem:[%s9194_s12 + $0x70] ss:$28 sps:$4 sm:$0xff]   ;;  %v6731_v0 = vld [vmem:[%s9194_s12 + $0x78] ss:$28 sps:$4 sm:$0xff]  }
 0x3af   : > { %v2786_v6 = vpack.c.bf16 %v2781_v4, %v2781_v4  ;;  %5267 = vst [vmem:[%s542_s18] sm:$0xff] %v2781_v4  ;;  %v6739_v4 = vld [vmem:[%s9194_s12 + $0xb4] ss:$28 sps:$4 sm:$0xff]  }
 0x3b1   : > { %2928 = vmatmul.mubr.bf16.vlgmr.msra.gmra.mrb[8].mxu1 %v2786_v6  ;;  %v6737_v6 = vld [vmem:[%s9194_s12 + $0xb0] ss:$28 sps:$4 sm:$0xff]  }
 0x3b2   : > { %3345 = vmatpush1.bf16.msra.mxu1 %v6620_v5  ;;  %v6734_v5 = vld [vmem:[%s9194_s12 + $0xa8] ss:$28 sps:$4 sm:$0xff]  }
 0x3b3   : > { %3346 = vmatprep.subr.bf16.mxu1 %v6628_v7  ;;  %v6742_v7 = vld [vmem:[%s9194_s12 + $0xe4] ss:$28 sps:$4 sm:$0xff]  }
 0x3b6   : > { %3347 = vmatpush1.bf16.msra.mxu1 %v6626_v8  ;;  %v6745_v8 = vld [vmem:[%s9194_s12 + $0xec] ss:$28 sps:$4 sm:$0xff]  }
 0x3b7   : > { %3348 = vmatprep.subr.bf16.mxu1 %v6634_v9  ;;  %v6740_v9 = vld [vmem:[%s9194_s12 + $0xe0] ss:$28 sps:$4 sm:$0xff]  }
 0x3ba   : > { %3349 = vmatpush1.bf16.msra.mxu1 %v6632_v10  ;;  %v6743_v10 = vld [vmem:[%s9194_s12 + $0xe8] ss:$28 sps:$4 sm:$0xff]  }
 0x3bb   : > { %3350 = vmatprep.subr.bf16.mxu1 %v6640_v11  ;;  %v6748_v11 = vld [vmem:[%s9194_s12 + $0x11c] ss:$28 sps:$4 sm:$0xff]  }
 0x3be   : > { %3351 = vmatpush1.bf16.msra.mxu1 %v6638_v13  ;;  %v6751_v13 = vld [vmem:[%s9194_s12 + $0x124] ss:$28 sps:$4 sm:$0xff]  }
 0x3bf   : > { %3352 = vmatprep.subr.bf16.mxu1 %v6646_v14  ;;  %v6746_v14 = vld [vmem:[%s9194_s12 + $0x118] ss:$28 sps:$4 sm:$0xff]  }
 0x3c2   : > { %3353 = vmatpush1.bf16.msra.mxu1 %v6644_v16  ;;  %v6749_v16 = vld [vmem:[%s9194_s12 + $0x120] ss:$28 sps:$4 sm:$0xff]  }
 0x3c3   : > { %3354 = vmatprep.subr.bf16.mxu1 %v6652_v12  ;;  %v6754_v12 = vld [vmem:[%s9194_s12 + $0x154] ss:$28 sps:$4 sm:$0xff]  }
 0x3c6   : > { %3355 = vmatpush1.bf16.msra.mxu1 %v6650_v17  ;;  %v6757_v17 = vld [vmem:[%s9194_s12 + $0x15c] ss:$28 sps:$4 sm:$0xff]  }
 0x3c7   : > { %3356 = vmatprep.subr.bf16.mxu1 %v6658_v15  ;;  %v6752_v15 = vld [vmem:[%s9194_s12 + $0x150] ss:$28 sps:$4 sm:$0xff]  }
 0x3ca   : > { %3357 = vmatpush1.bf16.msra.mxu1 %v6656_v18  ;;  %v6755_v18 = vld [vmem:[%s9194_s12 + $0x158] ss:$28 sps:$4 sm:$0xff]  }
 0x3cb   : > { %3358 = vmatprep.subr.bf16.mxu1 %v6664_v19  ;;  %v6760_v19 = vld [vmem:[%s9194_s12 + $0x18c] ss:$28 sps:$4 sm:$0xff]  }
 0x3ce   : > { %3359 = vmatpush1.bf16.msra.mxu1 %v6662_v20  ;;  %v6763_v20 = vld [vmem:[%s9194_s12 + $0x194] ss:$28 sps:$4 sm:$0xff]  }
 0x3cf   : > { %3360 = vmatprep.subr.bf16.mxu1 %v6670_v21  ;;  %v6758_v21 = vld [vmem:[%s9194_s12 + $0x188] ss:$28 sps:$4 sm:$0xff]  }
 0x3d2   : > { %3361 = vmatpush1.bf16.msra.mxu1 %v6668_v22  ;;  %v6761_v22 = vld [vmem:[%s9194_s12 + $0x190] ss:$28 sps:$4 sm:$0xff]  }
 0x3d3   : > { %3362 = vmatprep.subr.bf16.mxu1 %v6676_v23  ;;  %v6766_v23 = vld [vmem:[%s9194_s12 + $0x1c4] ss:$28 sps:$4 sm:$0xff]  }
 0x3d6   : > { %3363 = vmatpush1.bf16.msra.mxu1 %v6674_v24  ;;  %v6769_v24 = vld [vmem:[%s9194_s12 + $0x1cc] ss:$28 sps:$4 sm:$0xff]  }
 0x3d7   : > { %3364 = vmatprep.subr.bf16.mxu1 %v6682_v25  ;;  %v6764_v25 = vld [vmem:[%s9194_s12 + $0x1c0] ss:$28 sps:$4 sm:$0xff]  }
 0x3da   : > { %3365 = vmatpush1.bf16.msra.mxu1 %v6680_v26  ;;  %v6767_v26 = vld [vmem:[%s9194_s12 + $0x1c8] ss:$28 sps:$4 sm:$0xff]  }
 0x3db   : > { %3366 = vmatprep.subr.bf16.mxu1 %v6688_v27  ;;  %v6772_v27 = vld [vmem:[%s9194_s12 + $0x1fc] ss:$28 sps:$4 sm:$0xff]  }
 0x3de   : > { %3367 = vmatpush1.bf16.msra.mxu1 %v6686_v28  ;;  %v6775_v28 = vld [vmem:[%s9194_s12 + $0x204] ss:$28 sps:$4 sm:$0xff]  }
 0x3df   : > { %3368 = vmatprep.subr.bf16.mxu1 %v6694_v29  ;;  %v6770_v29 = vld [vmem:[%s9194_s12 + $0x1f8] ss:$28 sps:$4 sm:$0xff]  }
 0x3e2   : > { %3369 = vmatpush1.bf16.msra.mxu1 %v6692_v30  ;;  %v6773_v30 = vld [vmem:[%s9194_s12 + $0x200] ss:$28 sps:$4 sm:$0xff]  }
 0x3e3   : > { %3370 = vmatprep.subr.bf16.mxu1 %v6700_v31  ;;  %v6778_v31 = vld [vmem:[%s9194_s12 + $0x234] ss:$28 sps:$4 sm:$0xff]  }
 0x3e6   : > { %3371 = vmatpush1.bf16.msra.mxu1 %v6698_v32  ;;  %v6781_v32 = vld [vmem:[%s9194_s12 + $0x23c] ss:$28 sps:$4 sm:$0xff]  }
 0x3e7   : > { %3372 = vmatprep.subr.bf16.mxu1 %v6706_v33  ;;  %v6776_v33 = vld [vmem:[%s9194_s12 + $0x230] ss:$28 sps:$4 sm:$0xff]  }
 0x3ea   : > { %3373 = vmatpush1.bf16.msra.mxu1 %v6704_v34  ;;  %v6779_v34 = vld [vmem:[%s9194_s12 + $0x238] ss:$28 sps:$4 sm:$0xff]  }
 0x3eb   : > { %3374 = vmatprep.subr.bf16.mxu1 %v6712_v35  ;;  %v6784_v35 = vld [vmem:[%s9194_s12 + $0x26c] ss:$28 sps:$4 sm:$0xff]  }
 0x3ee   : > { %3375 = vmatpush1.bf16.msra.mxu1 %v6710_v37  ;;  %v6782_v37 = vld [vmem:[%s9194_s12 + $0x268] ss:$28 sps:$4 sm:$0xff]  }
 0x3ef   : > { %4875 = vmatprep.subr.bf16.mxu1 %v6718_v39  ;;  %v6790_v39 = vld [vmem:[%s9194_s12 + $0x2a4] ss:$28 sps:$4 sm:$0xff]  }
 0x484   : > { %v2929_v44 = vpop.f32.mrb[8].mxu1 }
 0x485   : > { %v2930_v45 = vadd.f32 %v2929_v44, %v2808_v42  ;;  %v2931_v46 = vpop.f32.mrb[9].mxu1  ;;  %v6791_v42 = vld [vmem:[%s9194_s12 + $0x2a8] ss:$28 sps:$4 sm:$0xff]  }
 0x486   : > { %v2932_v47 = vadd.f32 %v2931_v46, %v2812_v43  ;;  %v2933_v49 = vpop.f32.mrb[10].mxu1  ;;  %v6796_v43 = vld [vmem:[%s9194_s12 + $0x2dc] ss:$28 sps:$4 sm:$0xff]   ;;  %v6799_v44 = vld [vmem:[%s9194_s12 + $0x2e4] ss:$28 sps:$4 sm:$0xff]  }
 0x487   : > { %v2934_v50 = vpop.f32.mrb[11].mxu1  ;;  %v2936_v54 = vpack.c.bf16 %v2930_v45, %v2930_v45  ;;  %v6794_v45 = vld [vmem:[%s9194_s12 + $0x2d8] ss:$28 sps:$4 sm:$0xff]   ;;  %v6797_v46 = vld [vmem:[%s9194_s12 + $0x2e0] ss:$28 sps:$4 sm:$0xff]  }
 0x488   : > { %v2937_v51 = vpack.c.bf16 %v2932_v47, %v2932_v47  ;;  %v6802_v47 = vld [vmem:[%s9194_s12 + $0x314] ss:$28 sps:$4 sm:$0xff]   ;;  %v6805_v49 = vld [vmem:[%s9194_s12 + $0x31c] ss:$28 sps:$4 sm:$0xff]  }
 0x489   : > { %v6800_v50 = vld [vmem:[%s9194_s12 + $0x310] ss:$28 sps:$4 sm:$0xff]  }
 0x48a   : > { %3376 = vmatprep.mubr.bf16.mxu1 %v2937_v51  ;;  %3417 = vmatprep.mubr.bf16.mxu0 %v2937_v51  ;;  %v6803_v51 = vld [vmem:[%s9194_s12 + $0x318] ss:$28 sps:$4 sm:$0xff]  }
 0x48b   : > { %3377 = vmatmul.mubr.bf16.vlgmr.msra.gmra.mrb[12].mxu1 %v2936_v54  ;;  %3418 = vmatmul.mubr.bf16.vlgmr.msra.gmra.mrb[8].mxu0 %v2936_v54  ;;  %v6806_v54 = vld [vmem:[%s9194_s12 + $0x348] ss:$28 sps:$4 sm:$0xff]  }
 0x48c   : > { %4876 = vmatpush1.bf16.msra.mxu1 %v6716_v52  ;;  %4958 = vmatpush1.bf16.msra.mxu0 %v6719_v53  ;;  %v6808_v52 = vld [vmem:[%s9194_s12 + $0x34c] ss:$28 sps:$4 sm:$0xff]   ;;  %v6811_v53 = vld [vmem:[%s9194_s12 + $0x354] ss:$28 sps:$4 sm:$0xff]  }
 0x48d   : > { %4877 = vmatprep.subr.bf16.mxu1 %v6724_v55  ;;  %4959 = vmatprep.subr.bf16.mxu0 %v6727_v56  ;;  %v6809_v55 = vld [vmem:[%s9194_s12 + $0x350] ss:$28 sps:$4 sm:$0xff]   ;;  %v6814_v56 = vld [vmem:[%s9194_s12 + $0x384] ss:$28 sps:$4 sm:$0xff]  }
 0x490   : > { %4878 = vmatpush1.bf16.msra.mxu1 %v6722_v57  ;;  %4960 = vmatpush1.bf16.msra.mxu0 %v6725_v58  ;;  %v6817_v57 = vld [vmem:[%s9194_s12 + $0x38c] ss:$28 sps:$4 sm:$0xff]   ;;  %v8588_v58 = vld [vmem:[%s9193_s11] sm:$0xf] }
 0x491   : > { %4879 = vmatprep.subr.bf16.mxu1 %v6730_v59  ;;  %4961 = vmatprep.subr.bf16.mxu0 %v6733_v60  ;;  %v3007_v59 = vrot.slane %v8588_v58, %v7996_v63  ;;  %v3011_v60 = vrot.slane %v8588_v58, %v8004_v1 }
 0x494   : > { %4880 = vmatpush1.bf16.msra.mxu1 %v6728_v61  ;;  %4962 = vmatpush1.bf16.msra.mxu0 %v6731_v0  ;;  %v3019_v61 = vrot.slane %v8588_v58, %v8007_v2 }
 0x495   : > { %4881 = vmatprep.subr.bf16.mxu1 %v6736_v3  ;;  %4963 = vmatprep.subr.bf16.mxu0 %v6739_v4 }
 0x498   : > { %4882 = vmatpush1.bf16.msra.mxu1 %v6734_v5  ;;  %4964 = vmatpush1.bf16.msra.mxu0 %v6737_v6 }
 0x499   : > { %4883 = vmatprep.subr.bf16.mxu1 %v6742_v7  ;;  %4965 = vmatprep.subr.bf16.mxu0 %v6745_v8 }
 0x49c   : > { %4884 = vmatpush1.bf16.msra.mxu1 %v6740_v9  ;;  %4966 = vmatpush1.bf16.msra.mxu0 %v6743_v10 }
 0x49d   : > { %4885 = vmatprep.subr.bf16.mxu1 %v6748_v11  ;;  %4967 = vmatprep.subr.bf16.mxu0 %v6751_v13 }
 0x4a0   : > { %4886 = vmatpush1.bf16.msra.mxu1 %v6746_v14  ;;  %4968 = vmatpush1.bf16.msra.mxu0 %v6749_v16  ;;  %v6812_v16 = vld [vmem:[%s9194_s12 + $0x380] ss:$28 sps:$4 sm:$0xff]  }
 0x4a1   : > { %4887 = vmatprep.subr.bf16.mxu1 %v6754_v12  ;;  %4969 = vmatprep.subr.bf16.mxu0 %v6757_v17  ;;  %v6815_v12 = vld [vmem:[%s9194_s12 + $0x388] ss:$28 sps:$4 sm:$0xff]  }
 0x4a4   : > { %4888 = vmatpush1.bf16.msra.mxu1 %v6752_v15  ;;  %4970 = vmatpush1.bf16.msra.mxu0 %v6755_v18  ;;  %v6820_v15 = vld [vmem:[%s9194_s12 + $0x3bc] ss:$28 sps:$4 sm:$0xff]   ;;  %v6823_v18 = vld [vmem:[%s9194_s12 + $0x3c4] ss:$28 sps:$4 sm:$0xff]  }
 0x4a5   : > { %4889 = vmatprep.subr.bf16.mxu1 %v6760_v19  ;;  %4971 = vmatprep.subr.bf16.mxu0 %v6763_v20  ;;  %v6818_v20 = vld [vmem:[%s9194_s12 + $0x3b8] ss:$28 sps:$4 sm:$0xff]  }
 0x4a8   : > { %4890 = vmatpush1.bf16.msra.mxu1 %v6758_v21  ;;  %4972 = vmatpush1.bf16.msra.mxu0 %v6761_v22  ;;  %v6821_v21 = vld [vmem:[%s9194_s12 + $0x3c0] ss:$28 sps:$4 sm:$0xff]   ;;  %v6826_v22 = vld [vmem:[%s9194_s12 + $0x3f4] ss:$28 sps:$4 sm:$0xff]  }
 0x4a9   : > { %4891 = vmatprep.subr.bf16.mxu1 %v6766_v23  ;;  %4973 = vmatprep.subr.bf16.mxu0 %v6769_v24  ;;  %v6829_v23 = vld [vmem:[%s9194_s12 + $0x3fc] ss:$28 sps:$4 sm:$0xff]   ;;  %v6824_v24 = vld [vmem:[%s9194_s12 + $0x3f0] ss:$28 sps:$4 sm:$0xff]  }
 0x4ac   : > { %4892 = vmatpush1.bf16.msra.mxu1 %v6764_v25  ;;  %4974 = vmatpush1.bf16.msra.mxu0 %v6767_v26  ;;  %v6827_v25 = vld [vmem:[%s9194_s12 + $0x3f8] ss:$28 sps:$4 sm:$0xff]   ;;  %v6832_v26 = vld [vmem:[%s9194_s12 + $0x42c] ss:$28 sps:$4 sm:$0xff]  }
 0x4ad   : > { %4893 = vmatprep.subr.bf16.mxu1 %v6772_v27  ;;  %4975 = vmatprep.subr.bf16.mxu0 %v6775_v28  ;;  %v6835_v27 = vld [vmem:[%s9194_s12 + $0x434] ss:$28 sps:$4 sm:$0xff]   ;;  %v6830_v28 = vld [vmem:[%s9194_s12 + $0x428] ss:$28 sps:$4 sm:$0xff]  }
 0x4b0   : > { %4894 = vmatpush1.bf16.msra.mxu1 %v6770_v29  ;;  %4976 = vmatpush1.bf16.msra.mxu0 %v6773_v30  ;;  %v6833_v29 = vld [vmem:[%s9194_s12 + $0x430] ss:$28 sps:$4 sm:$0xff]   ;;  %v6838_v30 = vld [vmem:[%s9194_s12 + $0x464] ss:$28 sps:$4 sm:$0xff]  }
 0x4b1   : > { %4895 = vmatprep.subr.bf16.mxu1 %v6778_v31  ;;  %4977 = vmatprep.subr.bf16.mxu0 %v6781_v32  ;;  %v6841_v31 = vld [vmem:[%s9194_s12 + $0x46c] ss:$28 sps:$4 sm:$0xff]   ;;  %v6836_v32 = vld [vmem:[%s9194_s12 + $0x460] ss:$28 sps:$4 sm:$0xff]  }
 0x4b4   : > { %4896 = vmatpush1.bf16.msra.mxu1 %v6776_v33  ;;  %4978 = vmatpush1.bf16.msra.mxu0 %v6779_v34  ;;  %v6839_v33 = vld [vmem:[%s9194_s12 + $0x468] ss:$28 sps:$4 sm:$0xff]   ;;  %v6844_v34 = vld [vmem:[%s9194_s12 + $0x49c] ss:$28 sps:$4 sm:$0xff]  }
 0x4b5   : > { %4897 = vmatprep.subr.bf16.mxu1 %v6784_v35  ;;  %4979 = vmatprep.subr.bf16.mxu0 %v6787_v36  ;;  %v6847_v35 = vld [vmem:[%s9194_s12 + $0x4a4] ss:$28 sps:$4 sm:$0xff]   ;;  %v6842_v36 = vld [vmem:[%s9194_s12 + $0x498] ss:$28 sps:$4 sm:$0xff]  }
 0x4b8   : > { %4898 = vmatpush1.bf16.msra.mxu1 %v6782_v37  ;;  %4980 = vmatpush1.bf16.msra.mxu0 %v6785_v38  ;;  %v6845_v37 = vld [vmem:[%s9194_s12 + $0x4a0] ss:$28 sps:$4 sm:$0xff]   ;;  %v6850_v38 = vld [vmem:[%s9194_s12 + $0x4d4] ss:$28 sps:$4 sm:$0xff]  }
 0x4b9   : > { %4899 = vmatprep.subr.bf16.mxu1 %v6790_v39  ;;  %4981 = vmatprep.subr.bf16.mxu0 %v6793_v40  ;;  %v6853_v39 = vld [vmem:[%s9194_s12 + $0x4dc] ss:$28 sps:$4 sm:$0xff]   ;;  %v6848_v40 = vld [vmem:[%s9194_s12 + $0x4d0] ss:$28 sps:$4 sm:$0xff]  }
 0x4bc   : > { %4900 = vmatpush1.bf16.msra.mxu1 %v6788_v41  ;;  %4982 = vmatpush1.bf16.msra.mxu0 %v6791_v42  ;;  %v6851_v41 = vld [vmem:[%s9194_s12 + $0x4d8] ss:$28 sps:$4 sm:$0xff]   ;;  %v6856_v42 = vld [vmem:[%s9194_s12 + $0x50c] ss:$28 sps:$4 sm:$0xff]  }
 0x4bd   : > { %4901 = vmatprep.subr.bf16.mxu1 %v6796_v43  ;;  %4983 = vmatprep.subr.bf16.mxu0 %v6799_v44  ;;  %v6859_v43 = vld [vmem:[%s9194_s12 + $0x514] ss:$28 sps:$4 sm:$0xff]   ;;  %v6854_v44 = vld [vmem:[%s9194_s12 + $0x508] ss:$28 sps:$4 sm:$0xff]  }
 0x4c0   : > { %4902 = vmatpush1.bf16.msra.mxu1 %v6794_v45  ;;  %4984 = vmatpush1.bf16.msra.mxu0 %v6797_v46  ;;  %v6857_v45 = vld [vmem:[%s9194_s12 + $0x510] ss:$28 sps:$4 sm:$0xff]   ;;  %v6862_v46 = vld [vmem:[%s9194_s12 + $0x544] ss:$28 sps:$4 sm:$0xff]  }
 0x4c1   : > { %4903 = vmatprep.subr.bf16.mxu1 %v6802_v47  ;;  %4985 = vmatprep.subr.bf16.mxu0 %v6805_v49  ;;  %v6865_v47 = vld [vmem:[%s9194_s12 + $0x54c] ss:$28 sps:$4 sm:$0xff]   ;;  %v6860_v49 = vld [vmem:[%s9194_s12 + $0x540] ss:$28 sps:$4 sm:$0xff]  }
 0x4c4   : > { %4904 = vmatpush1.bf16.msra.mxu1 %v6800_v50  ;;  %4986 = vmatpush1.bf16.msra.mxu0 %v6803_v51  ;;  %v6863_v50 = vld [vmem:[%s9194_s12 + $0x548] ss:$28 sps:$4 sm:$0xff]   ;;  %v6868_v51 = vld [vmem:[%s9194_s12 + $0x57c] ss:$28 sps:$4 sm:$0xff]  }
 0x4c5   : > { %4905 = vmatprep.subr.bf16.mxu1 %v6808_v52  ;;  %4987 = vmatprep.subr.bf16.mxu0 %v6811_v53  ;;  %v6871_v52 = vld [vmem:[%s9194_s12 + $0x584] ss:$28 sps:$4 sm:$0xff]   ;;  %v6866_v53 = vld [vmem:[%s9194_s12 + $0x578] ss:$28 sps:$4 sm:$0xff]  }
 0x4c8   : > { %4906 = vmatpush1.bf16.msra.mxu1 %v6806_v54  ;;  %4988 = vmatpush1.bf16.msra.mxu0 %v6809_v55  ;;  %v6869_v54 = vld [vmem:[%s9194_s12 + $0x580] ss:$28 sps:$4 sm:$0xff]   ;;  %v6874_v55 = vld [vmem:[%s9194_s12 + $0x5b4] ss:$28 sps:$4 sm:$0xff]  }
 0x4c9   : > { %4916 = vmatprep.subr.bf16.mxu1 %v6814_v56  ;;  %4998 = vmatprep.subr.bf16.mxu0 %v6817_v57  ;;  %v6877_v56 = vld [vmem:[%s9194_s12 + $0x5bc] ss:$28 sps:$4 sm:$0xff]   ;;  %v6872_v57 = vld [vmem:[%s9194_s12 + $0x5b0] ss:$28 sps:$4 sm:$0xff]  }
 0x55e   : > { %v3378_v0 = vpop.f32.mrb[12].mxu1  ;;  %v8596_v3 = vpop.f32.mrb[8].mxu0 }
 0x55f   : > { %v3379_v4 = vadd.f32 %v3378_v0, %v3007_v59  ;;  %v3380_v5 = vpop.f32.mrb[13].mxu1  ;;  %v3421_v6 = vpop.f32.mrb[9].mxu0  ;;  %v6875_v59 = vld [vmem:[%s9194_s12 + $0x5b8] ss:$28 sps:$4 sm:$0xff]   ;;  %v6878_v0 = vld [vmem:[%s9194_s12 + $0x5e8] ss:$28 sps:$4 sm:$0xff]  }
 0x560   : > { %v3381_v7 = vadd.f32 %v3380_v5, %v3011_v60  ;;  %v3382_v8 = vpop.f32.mrb[14].mxu1  ;;  %v3423_v9 = vpop.f32.mrb[10].mxu0  ;;  %v3422_v10 = vadd.f32 %v3421_v6, %v3019_v61  ;;  %v6880_v60 = vld [vmem:[%s9194_s12 + $0x5ec] ss:$28 sps:$4 sm:$0xff]   ;;  %v6883_v61 = vld [vmem:[%s9194_s12 + $0x5f4] ss:$28 sps:$4 sm:$0xff]  }
 0x561   : > { %v3383_v11 = vpop.f32.mrb[15].mxu1  ;;  %v3424_v13 = vpop.f32.mrb[11].mxu0  ;;  %v8606_v17 = vpack.c.bf16 %v3379_v4, %v3379_v4  ;;  %v6881_v4 = vld [vmem:[%s9194_s12 + $0x5f0] ss:$28 sps:$4 sm:$0xff]   ;;  %v6886_v5 = vld [vmem:[%s9194_s12 + $0x624] ss:$28 sps:$4 sm:$0xff]  }
 0x562   : > { %v8598_v14 = vpack.c.bf16 %v3381_v7, %v3381_v7  ;;  %v8616_v19 = vpack.c.bf16 %v3422_v10, %v3422_v10  ;;  %v6889_v6 = vld [vmem:[%s9194_s12 + $0x62c] ss:$28 sps:$4 sm:$0xff]   ;;  %v6884_v7 = vld [vmem:[%s9194_s12 + $0x620] ss:$28 sps:$4 sm:$0xff]   ;;  %v6890_v11 = vld [vmem:[%s9194_s12 + $0x658] ss:$28 sps:$4 sm:$0xff]  }
 0x563   : > { %v6887_v8 = vld [vmem:[%s9194_s12 + $0x628] ss:$28 sps:$4 sm:$0xff]   ;;  %v6892_v9 = vld [vmem:[%s9194_s12 + $0x65c] ss:$28 sps:$4 sm:$0xff]  }
 0x564   : > { %4907 = vmatprep.mubr.bf16.mxu1 %v8598_v14  ;;  %4989 = vmatprep.mubr.bf16.mxu0 %v8598_v14  ;;  %v6895_v10 = vld [vmem:[%s9194_s12 + $0x664] ss:$28 sps:$4 sm:$0xff]  }
 0x565   : > { %4908 = vmatmul.mubr.bf16.vlgmr.msra.gmra.mrb[16].mxu1 %v8606_v17  ;;  %4990 = vmatmul.mubr.bf16.vlgmr.msra.gmra.mrb[12].mxu0 %v8606_v17  ;;  %v6893_v13 = vld [vmem:[%s9194_s12 + $0x660] ss:$28 sps:$4 sm:$0xff]  }
 0x566   : > { %4917 = vmatpush1.bf16.msra.mxu1 %v6812_v16  ;;  %4999 = vmatpush1.bf16.msra.mxu0 %v6815_v12  ;;  %v6898_v16 = vld [vmem:[%s9194_s12 + $0x694] ss:$28 sps:$4 sm:$0xff]   ;;  %v6901_v12 = vld [vmem:[%s9194_s12 + $0x69c] ss:$28 sps:$4 sm:$0xff]  }
 0x567   : > { %4948 = vmatprep.mubr.bf16.mxu1 %v8616_v19  ;;  %5030 = vmatprep.mubr.bf16.mxu0 %v8616_v19 }
 0x568   : > { %4918 = vmatprep.subr.bf16.mxu1 %v6820_v15  ;;  %5000 = vmatprep.subr.bf16.mxu0 %v6823_v18  ;;  %v6896_v15 = vld [vmem:[%s9194_s12 + $0x690] ss:$28 sps:$4 sm:$0xff]   ;;  %v6899_v18 = vld [vmem:[%s9194_s12 + $0x698] ss:$28 sps:$4 sm:$0xff]  }
 0x56a   : > { %4919 = vmatpush1.bf16.msra.mxu1 %v6818_v20  ;;  %5001 = vmatpush1.bf16.msra.mxu0 %v6821_v21  ;;  %v3015_v20 = vrot.slane %v8588_v58, %v8099_v48  ;;  %v6904_v21 = vld [vmem:[%s9194_s12 + $0x6cc] ss:$28 sps:$4 sm:$0xff]  }
 0x56b   : > { %4920 = vmatprep.subr.bf16.mxu1 %v6826_v22  ;;  %5002 = vmatprep.subr.bf16.mxu0 %v6829_v23  ;;  %v6907_v22 = vld [vmem:[%s9194_s12 + $0x6d4] ss:$28 sps:$4 sm:$0xff]   ;;  %v6902_v23 = vld [vmem:[%s9194_s12 + $0x6c8] ss:$28 sps:$4 sm:$0xff]  }
 0x56c   : > { %v6905_v58 = vld [vmem:[%s9194_s12 + $0x6d0] ss:$28 sps:$4 sm:$0xff]  }
 0x56e   : > { %4921 = vmatpush1.bf16.msra.mxu1 %v6824_v24  ;;  %5003 = vmatpush1.bf16.msra.mxu0 %v6827_v25  ;;  %v3420_v24 = vadd.f32 %v8596_v3, %v3015_v20  ;;  %v6910_v25 = vld [vmem:[%s9194_s12 + $0x14] ss:$28 sps:$4 sm:$0xff]  }
 0x56f   : > { %4922 = vmatprep.subr.bf16.mxu1 %v6832_v26  ;;  %5004 = vmatprep.subr.bf16.mxu0 %v6835_v27  ;;  %v6911_v26 = vld [vmem:[%s9194_s12 + $0x1d8] ss:$28 sps:$4 sm:$0xff]   ;;  %v6908_v27 = vld [vmem:[%s9194_s12 + $0x10] ss:$28 sps:$4 sm:$0xff]  }
 0x570   : > { %v6912_v3 = vld [vmem:[%s9194_s12 + $0x18] ss:$28 sps:$4 sm:$0xff]   ;;  %v6968_v20 = vld [vmem:[%s9194_s12 + $0x2b0] ss:$28 sps:$4 sm:$0xff]  }
 0x572   : > { %4923 = vmatpush1.bf16.msra.mxu1 %v6830_v28  ;;  %5005 = vmatpush1.bf16.msra.mxu0 %v6833_v29  ;;  %v8808_v28 = vpack.c.bf16 %v3420_v24, %v3420_v24  ;;  %v6915_v29 = vld [vmem:[%s9194_s12 + $0x4c] ss:$28 sps:$4 sm:$0xff]  }
 0x573   : > { %4924 = vmatprep.subr.bf16.mxu1 %v6838_v30  ;;  %5006 = vmatprep.subr.bf16.mxu0 %v6841_v31  ;;  %v6916_v30 = vld [vmem:[%s9194_s12 + $0x210] ss:$28 sps:$4 sm:$0xff]   ;;  %v6913_v31 = vld [vmem:[%s9194_s12 + $0x48] ss:$28 sps:$4 sm:$0xff]  }
 0x574   : > { %v6977_v24 = vld [vmem:[%s9194_s12 + $0x4b0] ss:$28 sps:$4 sm:$0xff]  }
 0x576   : > { %4925 = vmatpush1.bf16.msra.mxu1 %v6836_v32  ;;  %5007 = vmatpush1.bf16.msra.mxu0 %v6839_v33  ;;  %v6917_v32 = vld [vmem:[%s9194_s12 + $0x50] ss:$28 sps:$4 sm:$0xff]   ;;  %v6920_v33 = vld [vmem:[%s9194_s12 + $0x84] ss:$28 sps:$4 sm:$0xff]  }
 0x577   : > { %4926 = vmatprep.subr.bf16.mxu1 %v6844_v34  ;;  %5008 = vmatprep.subr.bf16.mxu0 %v6847_v35  ;;  %v6921_v34 = vld [vmem:[%s9194_s12 + $0x248] ss:$28 sps:$4 sm:$0xff]   ;;  %v6918_v35 = vld [vmem:[%s9194_s12 + $0x80] ss:$28 sps:$4 sm:$0xff]  }
 0x57a   : > { %4927 = vmatpush1.bf16.msra.mxu1 %v6842_v36  ;;  %5009 = vmatpush1.bf16.msra.mxu0 %v6845_v37  ;;  %v6925_v36 = vld [vmem:[%s9194_s12 + $0xbc] ss:$28 sps:$4 sm:$0xff]  }
 0x57b   : > { %4928 = vmatprep.subr.bf16.mxu1 %v6850_v38  ;;  %5010 = vmatprep.subr.bf16.mxu0 %v6853_v39  ;;  %v6926_v37 = vld [vmem:[%s9194_s12 + $0x280] ss:$28 sps:$4 sm:$0xff]   ;;  %v6923_v38 = vld [vmem:[%s9194_s12 + $0xb8] ss:$28 sps:$4 sm:$0xff]  }
 0x57c   : > { %v6927_v39 = vld [vmem:[%s9194_s12 + $0xc0] ss:$28 sps:$4 sm:$0xff]  }
 0x57e   : > { %4929 = vmatpush1.bf16.msra.mxu1 %v6848_v40  ;;  %5011 = vmatpush1.bf16.msra.mxu0 %v6851_v41  ;;  %v6930_v40 = vld [vmem:[%s9194_s12 + $0xf4] ss:$28 sps:$4 sm:$0xff]  }
 0x57f   : > { %4930 = vmatprep.subr.bf16.mxu1 %v6856_v42  ;;  %5012 = vmatprep.subr.bf16.mxu0 %v6859_v43  ;;  %v6931_v41 = vld [vmem:[%s9194_s12 + $0x2b8] ss:$28 sps:$4 sm:$0xff]   ;;  %v6928_v42 = vld [vmem:[%s9194_s12 + $0xf0] ss:$28 sps:$4 sm:$0xff]  }
 0x580   : > { %v6932_v43 = vld [vmem:[%s9194_s12 + $0xf8] ss:$28 sps:$4 sm:$0xff]  }
 0x582   : > { %4931 = vmatpush1.bf16.msra.mxu1 %v6854_v44  ;;  %5013 = vmatpush1.bf16.msra.mxu0 %v6857_v45  ;;  %v6935_v44 = vld [vmem:[%s9194_s12 + $0x12c] ss:$28 sps:$4 sm:$0xff]  }
 0x583   : > { %4932 = vmatprep.subr.bf16.mxu1 %v6862_v46  ;;  %5014 = vmatprep.subr.bf16.mxu0 %v6865_v47  ;;  %v6936_v45 = vld [vmem:[%s9194_s12 + $0x2f0] ss:$28 sps:$4 sm:$0xff]   ;;  %v6933_v46 = vld [vmem:[%s9194_s12 + $0x128] ss:$28 sps:$4 sm:$0xff]  }
 0x584   : > { %v6937_v47 = vld [vmem:[%s9194_s12 + $0x130] ss:$28 sps:$4 sm:$0xff]  }
 0x586   : > { %4933 = vmatpush1.bf16.msra.mxu1 %v6860_v49  ;;  %5015 = vmatpush1.bf16.msra.mxu0 %v6863_v50  ;;  %v6940_v49 = vld [vmem:[%s9194_s12 + $0x164] ss:$28 sps:$4 sm:$0xff]  }
 0x587   : > { %4934 = vmatprep.subr.bf16.mxu1 %v6868_v51  ;;  %5016 = vmatprep.subr.bf16.mxu0 %v6871_v52  ;;  %v6941_v50 = vld [vmem:[%s9194_s12 + $0x328] ss:$28 sps:$4 sm:$0xff]   ;;  %v6938_v51 = vld [vmem:[%s9194_s12 + $0x160] ss:$28 sps:$4 sm:$0xff]  }
 0x588   : > { %v6942_v52 = vld [vmem:[%s9194_s12 + $0x168] ss:$28 sps:$4 sm:$0xff]  }
 0x58a   : > { %4935 = vmatpush1.bf16.msra.mxu1 %v6866_v53  ;;  %5017 = vmatpush1.bf16.msra.mxu0 %v6869_v54  ;;  %v6945_v53 = vld [vmem:[%s9194_s12 + $0x19c] ss:$28 sps:$4 sm:$0xff]  }
 0x58b   : > { %4936 = vmatprep.subr.bf16.mxu1 %v6874_v55  ;;  %5018 = vmatprep.subr.bf16.mxu0 %v6877_v56  ;;  %v6946_v54 = vld [vmem:[%s9194_s12 + $0x360] ss:$28 sps:$4 sm:$0xff]   ;;  %v6943_v55 = vld [vmem:[%s9194_s12 + $0x198] ss:$28 sps:$4 sm:$0xff]  }
 0x58c   : > { %v6947_v56 = vld [vmem:[%s9194_s12 + $0x1a0] ss:$28 sps:$4 sm:$0xff]  }
 0x58e   : > { %4937 = vmatpush1.bf16.msra.mxu1 %v6872_v57  ;;  %5019 = vmatpush1.bf16.msra.mxu0 %v6875_v59  ;;  %v6950_v57 = vld [vmem:[%s9194_s12 + $0x1d4] ss:$28 sps:$4 sm:$0xff]  }
 0x58f   : > { %4938 = vmatprep.subr.bf16.mxu1 %v6880_v60  ;;  %5020 = vmatprep.subr.bf16.mxu0 %v6883_v61  ;;  %v6951_v59 = vld [vmem:[%s9194_s12 + $0x558] ss:$28 sps:$4 sm:$0xff]   ;;  %v6948_v60 = vld [vmem:[%s9194_s12 + $0x1d0] ss:$28 sps:$4 sm:$0xff]  }
 0x590   : > { %v6952_v61 = vld [vmem:[%s9194_s12 + $0x398] ss:$28 sps:$4 sm:$0xff]  }
 0x592   : > { %4939 = vmatpush1.bf16.msra.mxu1 %v6878_v0  ;;  %5021 = vmatpush1.bf16.msra.mxu0 %v6881_v4  ;;  %v6955_v0 = vld [vmem:[%s9194_s12 + $0x20c] ss:$28 sps:$4 sm:$0xff]  }
 0x593   : > { %4940 = vmatprep.subr.bf16.mxu1 %v6886_v5  ;;  %5022 = vmatprep.subr.bf16.mxu0 %v6889_v6  ;;  %v6956_v4 = vld [vmem:[%s9194_s12 + $0x590] ss:$28 sps:$4 sm:$0xff]   ;;  %v6953_v5 = vld [vmem:[%s9194_s12 + $0x208] ss:$28 sps:$4 sm:$0xff]  }
 0x594   : > { %v6957_v6 = vld [vmem:[%s9194_s12 + $0x3d0] ss:$28 sps:$4 sm:$0xff]  }
 0x596   : > { %4941 = vmatpush1.bf16.msra.mxu1 %v6884_v7  ;;  %5023 = vmatpush1.bf16.msra.mxu0 %v6887_v8  ;;  %v6960_v7 = vld [vmem:[%s9194_s12 + $0x244] ss:$28 sps:$4 sm:$0xff]  }
 0x597   : > { %4942 = vmatprep.subr.bf16.mxu1 %v6892_v9  ;;  %5024 = vmatprep.subr.bf16.mxu0 %v6895_v10  ;;  %v6961_v8 = vld [vmem:[%s9194_s12 + $0x5c8] ss:$28 sps:$4 sm:$0xff]   ;;  %v6958_v9 = vld [vmem:[%s9194_s12 + $0x240] ss:$28 sps:$4 sm:$0xff]  }
 0x598   : > { %v6962_v10 = vld [vmem:[%s9194_s12 + $0x408] ss:$28 sps:$4 sm:$0xff]  }
 0x59a   : > { %4943 = vmatpush1.bf16.msra.mxu1 %v6890_v11  ;;  %5025 = vmatpush1.bf16.msra.mxu0 %v6893_v13  ;;  %v6965_v11 = vld [vmem:[%s9194_s12 + $0x27c] ss:$28 sps:$4 sm:$0xff]  }
 0x59b   : > { %4944 = vmatprep.subr.bf16.mxu1 %v6898_v16  ;;  %5026 = vmatprep.subr.bf16.mxu0 %v6901_v12  ;;  %v6966_v13 = vld [vmem:[%s9194_s12 + $0x600] ss:$28 sps:$4 sm:$0xff]   ;;  %v6963_v16 = vld [vmem:[%s9194_s12 + $0x278] ss:$28 sps:$4 sm:$0xff]  }
 0x59c   : > { %v6967_v12 = vld [vmem:[%s9194_s12 + $0x440] ss:$28 sps:$4 sm:$0xff]  }
 0x59e   : > { %4945 = vmatpush1.bf16.msra.mxu1 %v6896_v15  ;;  %5027 = vmatpush1.bf16.msra.mxu0 %v6899_v18  ;;  %v6970_v15 = vld [vmem:[%s9194_s12 + $0x2b4] ss:$28 sps:$4 sm:$0xff]  }
 0x59f   : > { %4946 = vmatprep.subr.bf16.mxu1 %v6904_v21  ;;  %5028 = vmatprep.subr.bf16.mxu0 %v6907_v22  ;;  %v6971_v18 = vld [vmem:[%s9194_s12 + $0x638] ss:$28 sps:$4 sm:$0xff]   ;;  %v6975_v22 = vld [vmem:[%s9194_s12 + $0x2ec] ss:$28 sps:$4 sm:$0xff]  }
 0x5a0   : > { %v6972_v21 = vld [vmem:[%s9194_s12 + $0x478] ss:$28 sps:$4 sm:$0xff]  }
 0x5a2   : > { %4947 = vmatpush1.bf16.msra.mxu1 %v6902_v23  ;;  %5029 = vmatpush1.bf16.msra.mxu0 %v6905_v58  ;;  %v6976_v23 = vld [vmem:[%s9194_s12 + $0x670] ss:$28 sps:$4 sm:$0xff]   ;;  %v6973_v58 = vld [vmem:[%s9194_s12 + $0x2e8] ss:$28 sps:$4 sm:$0xff]  }
 0x5a3   : > { %5039 = vmatprep.subr.bf16.mxu1 %v6910_v25  ;;  %6043 = vmatprep.subr.bf16.mxu0 %v6911_v26  ;;  %v6980_v25 = vld [vmem:[%s9194_s12 + $0x324] ss:$28 sps:$4 sm:$0xff]  }
 0x5a4   : > { %v6981_v26 = vld [vmem:[%s9194_s12 + $0x6a8] ss:$28 sps:$4 sm:$0xff]  }
 0x5a5   : > { %4949 = vmatmul.mubr.bf16.vlgmr.msra.gmra.mrb[16].mxu1 %v8808_v28  ;;  %5031 = vmatmul.mubr.bf16.vlgmr.msra.gmra.mrb[12].mxu0 %v8808_v28 }
 0x5a6   : > { %5040 = vmatpush1.bf16.msra.mxu1 %v6908_v27  ;;  %5071 = vmatprep.mubr.bf16.mxu1 %v8598_v14  ;;  %v6978_v27 = vld [vmem:[%s9194_s12 + $0x320] ss:$28 sps:$4 sm:$0xff]  }
 0x5a7   : > { %6044 = vmatpush3.bf16.msra.mxu0 %v6912_v3  ;;  %5153 = vmatprep.mubr.bf16.mxu0 %v8598_v14  ;;  %v6922_v14 = vld [vmem:[%s9194_s12 + $0x88] ss:$28 sps:$4 sm:$0xff]  }
 0x5a8   : > { %5041 = vmatprep.subr.bf16.mxu1 %v6915_v29  ;;  %6045 = vmatprep.subr.bf16.mxu0 %v6916_v30  ;;  %v6982_v3 = vld [vmem:[%s9194_s12 + $0x4e8] ss:$28 sps:$4 sm:$0xff]   ;;  %v6985_v29 = vld [vmem:[%s9194_s12 + $0x35c] ss:$28 sps:$4 sm:$0xff]  }
 0x5a9   : > { %v6986_v30 = vld [vmem:[%s9194_s12 + $0x6e0] ss:$28 sps:$4 sm:$0xff]  }
 0x5aa   : > { %5042 = vmatpush1.bf16.msra.mxu1 %v6913_v31  ;;  %v6983_v31 = vld [vmem:[%s9194_s12 + $0x358] ss:$28 sps:$4 sm:$0xff]  }
 0x5ab   : > { %6046 = vmatpush3.bf16.msra.mxu0 %v6917_v32  ;;  %5043 = vmatprep.subr.bf16.mxu1 %v6920_v33  ;;  %v6987_v32 = vld [vmem:[%s9194_s12 + $0x520] ss:$28 sps:$4 sm:$0xff]   ;;  %v6990_v33 = vld [vmem:[%s9194_s12 + $0x394] ss:$28 sps:$4 sm:$0xff]  }
 0x5ac   : > { %6047 = vmatprep.subr.bf16.mxu0 %v6921_v34  ;;  %v6988_v34 = vld [vmem:[%s9194_s12 + $0x390] ss:$28 sps:$4 sm:$0xff]  }
 0x5ae   : > { %5044 = vmatpush1.bf16.msra.mxu1 %v6918_v35  ;;  %v6993_v35 = vld [vmem:[%s9194_s12 + $0x3cc] ss:$28 sps:$4 sm:$0xff]  }
 0x5af   : > { %6048 = vmatpush3.bf16.msra.mxu0 %v6922_v14  ;;  %5045 = vmatprep.subr.bf16.mxu1 %v6925_v36  ;;  %v6991_v14 = vld [vmem:[%s9194_s12 + $0x3c8] ss:$28 sps:$4 sm:$0xff]  }
 0x5b0   : > { %6049 = vmatprep.subr.bf16.mxu0 %v6926_v37  ;;  %v6996_v36 = vld [vmem:[%s9194_s12 + $0x404] ss:$28 sps:$4 sm:$0xff]  }
 0x5b1   : > { %v6994_v37 = vld [vmem:[%s9194_s12 + $0x400] ss:$28 sps:$4 sm:$0xff]  }
 0x5b2   : > { %5046 = vmatpush1.bf16.msra.mxu1 %v6923_v38  ;;  %v7002_v38 = vld [vmem:[%s9194_s12 + $0x474] ss:$28 sps:$4 sm:$0xff]  }
 0x5b3   : > { %6050 = vmatpush3.bf16.msra.mxu0 %v6927_v39  ;;  %5047 = vmatprep.subr.bf16.mxu1 %v6930_v40  ;;  %v7000_v39 = vld [vmem:[%s9194_s12 + $0x470] ss:$28 sps:$4 sm:$0xff]  }
 0x5b4   : > { %6051 = vmatprep.subr.bf16.mxu0 %v6931_v41  ;;  %v7005_v40 = vld [vmem:[%s9194_s12 + $0x4ac] ss:$28 sps:$4 sm:$0xff]  }
 0x5b5   : > { %v7003_v41 = vld [vmem:[%s9194_s12 + $0x4a8] ss:$28 sps:$4 sm:$0xff]  }
 0x5b6   : > { %5048 = vmatpush1.bf16.msra.mxu1 %v6928_v42  ;;  %v7008_v42 = vld [vmem:[%s9194_s12 + $0x4e4] ss:$28 sps:$4 sm:$0xff]  }
 0x5b7   : > { %6052 = vmatpush3.bf16.msra.mxu0 %v6932_v43  ;;  %5049 = vmatprep.subr.bf16.mxu1 %v6935_v44  ;;  %v7006_v43 = vld [vmem:[%s9194_s12 + $0x4e0] ss:$28 sps:$4 sm:$0xff]  }
 0x5b8   : > { %6053 = vmatprep.subr.bf16.mxu0 %v6936_v45  ;;  %v7011_v44 = vld [vmem:[%s9194_s12 + $0x51c] ss:$28 sps:$4 sm:$0xff]  }
 0x5b9   : > { %v7009_v45 = vld [vmem:[%s9194_s12 + $0x518] ss:$28 sps:$4 sm:$0xff]  }
 0x5ba   : > { %5050 = vmatpush1.bf16.msra.mxu1 %v6933_v46  ;;  %v7014_v46 = vld [vmem:[%s9194_s12 + $0x554] ss:$28 sps:$4 sm:$0xff]  }
 0x5bb   : > { %6054 = vmatpush3.bf16.msra.mxu0 %v6937_v47  ;;  %5051 = vmatprep.subr.bf16.mxu1 %v6940_v49  ;;  %v7012_v47 = vld [vmem:[%s9194_s12 + $0x550] ss:$28 sps:$4 sm:$0xff]  }
 0x5bc   : > { %6055 = vmatprep.subr.bf16.mxu0 %v6941_v50  ;;  %v7017_v49 = vld [vmem:[%s9194_s12 + $0x58c] ss:$28 sps:$4 sm:$0xff]  }
 0x5bd   : > { %v7015_v50 = vld [vmem:[%s9194_s12 + $0x588] ss:$28 sps:$4 sm:$0xff]  }
 0x5be   : > { %5052 = vmatpush1.bf16.msra.mxu1 %v6938_v51  ;;  %v7020_v51 = vld [vmem:[%s9194_s12 + $0x5c4] ss:$28 sps:$4 sm:$0xff]  }
 0x5bf   : > { %6056 = vmatpush3.bf16.msra.mxu0 %v6942_v52  ;;  %5053 = vmatprep.subr.bf16.mxu1 %v6945_v53  ;;  %v7018_v52 = vld [vmem:[%s9194_s12 + $0x5c0] ss:$28 sps:$4 sm:$0xff]  }
 0x5c0   : > { %6057 = vmatprep.subr.bf16.mxu0 %v6946_v54  ;;  %v7023_v53 = vld [vmem:[%s9194_s12 + $0x5fc] ss:$28 sps:$4 sm:$0xff]  }
 0x5c1   : > { %v7021_v54 = vld [vmem:[%s9194_s12 + $0x5f8] ss:$28 sps:$4 sm:$0xff]  }
 0x5c2   : > { %5054 = vmatpush1.bf16.msra.mxu1 %v6943_v55  ;;  %v7026_v55 = vld [vmem:[%s9194_s12 + $0x634] ss:$28 sps:$4 sm:$0xff]  }
 0x5c3   : > { %6058 = vmatpush3.bf16.msra.mxu0 %v6947_v56  ;;  %5055 = vmatprep.subr.bf16.mxu1 %v6950_v57  ;;  %v7024_v56 = vld [vmem:[%s9194_s12 + $0x630] ss:$28 sps:$4 sm:$0xff]  }
 0x5c4   : > { %6065 = vmatprep.subr.bf16.mxu0 %v6951_v59  ;;  %v7029_v57 = vld [vmem:[%s9194_s12 + $0x66c] ss:$28 sps:$4 sm:$0xff]  }
 0x5c5   : > { %v7027_v59 = vld [vmem:[%s9194_s12 + $0x668] ss:$28 sps:$4 sm:$0xff]  }
 0x5c6   : > { %5154 = vmatmul.mubr.bf16.vlgmr.msra.gmra.mrb[16].mxu0 %v8606_v17  ;;  %5056 = vmatpush1.bf16.msra.mxu1 %v6948_v60  ;;  %v7032_v60 = vld [vmem:[%s9194_s12 + $0x6a4] ss:$28 sps:$4 sm:$0xff]  }
 0x5c7   : > { %6066 = vmatpush3.bf16.msra.mxu0 %v6952_v61  ;;  %5193 = vmatprep.mubr.bf16.mxu0 %v8616_v19  ;;  %v7030_v61 = vld [vmem:[%s9194_s12 + $0x6a0] ss:$28 sps:$4 sm:$0xff]  }
 0x5c8   : > { %5057 = vmatprep.subr.bf16.mxu1 %v6955_v0  ;;  %6067 = vmatprep.subr.bf16.mxu0 %v6956_v4  ;;  %v7035_v0 = vld [vmem:[%s9194_s12 + $0x6dc] ss:$28 sps:$4 sm:$0xff]  }
 0x5c9   : > { %v7033_v4 = vld [vmem:[%s9194_s12 + $0x6d8] ss:$28 sps:$4 sm:$0xff]  }
 0x5ca   : > { %5058 = vmatpush1.bf16.msra.mxu1 %v6953_v5  ;;  %v3686_v5 = vld [vmem:[%s9195_s13] sm:$0x7f] }
 0x5cb   : > { %6068 = vmatpush3.bf16.msra.mxu0 %v6957_v6  ;;  %5059 = vmatprep.subr.bf16.mxu1 %v6960_v7  ;;  %v3691_v6 = vrot.slane %v3686_v5, %v7996_v63  ;;  %v3699_v7 = vrot.slane %v3686_v5, %v8099_v48 }
 0x5cc   : > { %6069 = vmatprep.subr.bf16.mxu0 %v6961_v8  ;;  %v3695_v8 = vrot.slane %v3686_v5, %v8004_v1  ;;  %v569_v1 = vld [vmem:[%s9106_s27 + $0x18] sm:$0xff] }
 0x5ce   : > { %5060 = vmatpush1.bf16.msra.mxu1 %v6958_v9  ;;  %v566_v9 = vld [vmem:[%s9106_s27] sm:$0xff] }
 0x5cf   : > { %6070 = vmatpush3.bf16.msra.mxu0 %v6962_v10  ;;  %5061 = vmatprep.subr.bf16.mxu1 %v6965_v11 }
 0x5d0   : > { %6071 = vmatprep.subr.bf16.mxu0 %v6966_v13 }
 0x5d2   : > { %5062 = vmatpush1.bf16.msra.mxu1 %v6963_v16  ;;  %v568_v16 = vld [vmem:[%s9106_s27 + $0x10] sm:$0xff] }
 0x5d3   : > { %6072 = vmatpush3.bf16.msra.mxu0 %v6967_v12  ;;  %5063 = vmatprep.subr.bf16.mxu1 %v6970_v15  ;;  %v567_v15 = vld [vmem:[%s9106_s27 + $0x8] sm:$0xff] }
 0x5d4   : > { %6073 = vmatprep.subr.bf16.mxu0 %v6971_v18 }
 0x5d6   : > { %5064 = vmatpush1.bf16.msra.mxu1 %v6968_v20 }
 0x5d7   : > { %6074 = vmatpush3.bf16.msra.mxu0 %v6972_v21  ;;  %5065 = vmatprep.subr.bf16.mxu1 %v6975_v22 }
 0x5d8   : > { %6075 = vmatprep.subr.bf16.mxu0 %v6976_v23 }
 0x5da   : > { %5066 = vmatpush1.bf16.msra.mxu1 %v6973_v58 }
 0x5db   : > { %6076 = vmatpush3.bf16.msra.mxu0 %v6977_v24  ;;  %5067 = vmatprep.subr.bf16.mxu1 %v6980_v25 }
 0x5dc   : > { %6077 = vmatprep.subr.bf16.mxu0 %v6981_v26 }
 0x5de   : > { %5068 = vmatpush1.bf16.msra.mxu1 %v6978_v27 }
 0x5df   : > { %6078 = vmatpush3.bf16.msra.mxu0 %v6982_v3  ;;  %5069 = vmatprep.subr.bf16.mxu1 %v6985_v29 }
 0x5e0   : > { %6079 = vmatprep.subr.bf16.mxu0 %v6986_v30 }
 0x5e2   : > { %5070 = vmatpush1.bf16.msra.mxu1 %v6983_v31 }
 0x5e3   : > { %6080 = vmatpush3.bf16.msra.mxu0 %v6987_v32  ;;  %5080 = vmatprep.subr.bf16.mxu1 %v6990_v33 }
 0x5e5   : > { %5072 = vmatmul.mubr.bf16.vlgmr.msra.gmra.mrb[20].mxu1 %v8606_v17  ;;  %v6999_v17 = vld [vmem:[%s9194_s12 + $0x43c] ss:$28 sps:$4 sm:$0xff]  }
 0x5e6   : > { %5194 = vmatmul.mubr.bf16.vlgmr.msra.gmra.mrb[20].mxu0 %v8808_v28  ;;  %5081 = vmatpush1.bf16.msra.mxu1 %v6988_v34 }
 0x5e7   : > { %5112 = vmatprep.mubr.bf16.mxu1 %v8616_v19  ;;  %5082 = vmatprep.subr.bf16.mxu1 %v6993_v35  ;;  %v6997_v19 = vld [vmem:[%s9194_s12 + $0x438] ss:$28 sps:$4 sm:$0xff]  }
 0x5ea   : > { %5083 = vmatpush1.bf16.msra.mxu1 %v6991_v14 }
 0x5eb   : > { %5084 = vmatprep.subr.bf16.mxu1 %v6996_v36 }
 0x5ee   : > { %5085 = vmatpush1.bf16.msra.mxu1 %v6994_v37 }
 0x5ef   : > { %5086 = vmatprep.subr.bf16.mxu1 %v6999_v17 }
 0x5f2   : > { %5087 = vmatpush1.bf16.msra.mxu1 %v6997_v19 }
 0x5f3   : > { %5088 = vmatprep.subr.bf16.mxu1 %v7002_v38  ;;  %v3714_v38 = vsub.s32 6, %v7993_v62 }
 0x5f6   : > { %5089 = vmatpush1.bf16.msra.mxu1 %v7000_v39  ;;  %v3715_v39 = vrot.slane %v3686_v5, %v3714_v38 }
 0x5f7   : > { %5090 = vmatprep.subr.bf16.mxu1 %v7005_v40 }
 0x5fa   : > { %5091 = vmatpush1.bf16.msra.mxu1 %v7003_v41 }
 0x5fb   : > { %5092 = vmatprep.subr.bf16.mxu1 %v7008_v42 }
 0x5fe   : > { %5093 = vmatpush1.bf16.msra.mxu1 %v7006_v43 }
 0x5ff   : > { %5094 = vmatprep.subr.bf16.mxu1 %v7011_v44 }
 0x602   : > { %5095 = vmatpush1.bf16.msra.mxu1 %v7009_v45 }
 0x603   : > { %5096 = vmatprep.subr.bf16.mxu1 %v7014_v46 }
 0x606   : > { %5097 = vmatpush1.bf16.msra.mxu1 %v7012_v47 }
 0x607   : > { %5098 = vmatprep.subr.bf16.mxu1 %v7017_v49  ;;  %v3706_v49 = vsub.s32 4, %v7993_v62 }
 0x60a   : > { %5099 = vmatpush1.bf16.msra.mxu1 %v7015_v50  ;;  %v3710_v50 = vsub.s32 5, %v7993_v62 }
 0x60b   : > { %5100 = vmatprep.subr.bf16.mxu1 %v7020_v51  ;;  %v3707_v51 = vrot.slane %v3686_v5, %v3706_v49 }
 0x60e   : > { %5101 = vmatpush1.bf16.msra.mxu1 %v7018_v52  ;;  %v3711_v52 = vrot.slane %v3686_v5, %v3710_v50 }
 0x60f   : > { %5102 = vmatprep.subr.bf16.mxu1 %v7023_v53  ;;  %v572_v53 = vld [vmem:[%s9106_s27 + $0x30] sm:$0xff] }
 0x612   : > { %5103 = vmatpush1.bf16.msra.mxu1 %v7021_v54  ;;  %v570_v54 = vld [vmem:[%s9106_s27 + $0x20] sm:$0xff] }
 0x613   : > { %5104 = vmatprep.subr.bf16.mxu1 %v7026_v55 }
 0x616   : > { %5105 = vmatpush1.bf16.msra.mxu1 %v7024_v56 }
 0x617   : > { %5106 = vmatprep.subr.bf16.mxu1 %v7029_v57  ;;  %v571_v57 = vld [vmem:[%s9106_s27 + $0x28] sm:$0xff]  ;;  %s9221_s27 = sand.u32 1, %s7090_s22  }
 0x618   : > { %s5277_s19 = scalar_lea.sflag [#allocation3], %s9221_s27 }
 0x61a   : > { %5107 = vmatpush1.bf16.msra.mxu1 %v7027_v59 }
 0x61b   : > { %5108 = vmatprep.subr.bf16.mxu1 %v7032_v60 }
 0x61e   : > { %5109 = vmatpush1.bf16.msra.mxu1 %v7030_v61 }
 0x61f   : > { %5110 = vmatprep.subr.bf16.mxu1 %v7035_v0 }
 0x622   : > { %5111 = vmatpush1.bf16.msra.mxu1 %v7033_v4 }
 0x625   : > { %5113 = vmatmul.mubr.bf16.vlgmr.msra.gmra.mrb[20].mxu1 %v8808_v28  ;;  %v3703_v28 = vrot.slane %v3686_v5, %v8007_v2 }
 0x678   : > { %v4950_v10 = vpop.f32.mrb[16].mxu1  ;;  %v5032_v11 = vpop.f32.mrb[12].mxu0 }
 0x679   : > { %v6093_v13 = vadd.f32 %v4950_v10, %v3691_v6  ;;  %v6095_v12 = vadd.f32 %v5032_v11, %v3699_v7  ;;  %v4952_v18 = vpop.f32.mrb[17].mxu1  ;;  %v5034_v20 = vpop.f32.mrb[13].mxu0 }
 0x67a   : > { %v6094_v21 = vadd.f32 %v4952_v18, %v3695_v8  ;;  %v6096_v22 = vadd.f32 %v5034_v20, %v3703_v28  ;;  %v4954_v63 = vpop.f32.mrb[18].mxu1  ;;  %v5036_v23 = vpop.f32.mrb[14].mxu0 }
 0x67b   : > { %v5201_v48 = vsub.f32 %v566_v9, %v6093_v13  ;;  %v4955_v2 = vpop.f32.mrb[19].mxu1  ;;  %v5037_v58 = vpop.f32.mrb[15].mxu0  ;;  %v5203_v24 = vsub.f32 %v568_v16, %v6095_v12 }
 0x67c   : > { %v5202_v25 = vsub.f32 %v567_v15, %v6094_v21  ;;  %v6017_v26 = vpack.c.bf16 %v6094_v21, %v6093_v13  ;;  %v6018_v27 = vpack.c.bf16 %v6096_v22, %v6095_v12  ;;  %v5204_v30 = vsub.f32 %v569_v1, %v6096_v22 }
 0x67d   : > { %v5208_v3 = vmul.f32 %v5201_v48, %v5201_v48  ;;  %v5210_v31 = vmul.f32 %v5203_v24, %v5203_v24 }
 0x67e   : > { %v5209_v29 = vmul.f32 %v5202_v25, %v5202_v25  ;;  %5262 = vst [vmem:[%s9120_s17] sm:$0xff] %v6017_v26  ;;  %5263 = vst [vmem:[%s9120_s17 + $0x8] sm:$0xff] %v6018_v27  ;;  %v5211_v33 = vmul.f32 %v5204_v30, %v5204_v30 }
 0x680   : > { %v5215_v32 = vadd.f32 %v5209_v29, %v5208_v3 }
 0x682   : > { %v5216_v34 = vadd.f32 %v5215_v32, %v5210_v31 }
 0x684   : > { %v5217_v35 = vadd.f32 %v5216_v34, %v5211_v33 }
 0x699   : > { %v6059_v14 = vpop.f32.mrb[16].mxu0 }
 0x69a   : > { %v6060_v36 = vpop.f32.mrb[17].mxu0 }
 0x69b   : > { %v6061_v37 = vadd.f32 %v6060_v36, %v6059_v14  ;;  %v6062_v17 = vpop.f32.mrb[18].mxu0 }
 0x69c   : > { %v6063_v19 = vpop.f32.mrb[19].mxu0 }
 0x69d   : > { %v5156_v42 = vadd.f32 %v6061_v37, %v3715_v39 }
 0x6b9   : > { %v6081_v40 = vpop.f32.mrb[20].mxu0 }
 0x6ba   : > { %v6082_v41 = vpop.f32.mrb[21].mxu0 }
 0x6bb   : > { %v6083_v43 = vadd.f32 %v6082_v41, %v6081_v40  ;;  %v6084_v44 = vpop.f32.mrb[22].mxu0 }
 0x6bc   : > { %v6085_v45 = vpop.f32.mrb[23].mxu0 }
 0x6bd   : > { %v5196_v46 = vadd.f32 %v6083_v43, %v5156_v42 }
 0x6bf   : > { %v6020_v47 = vpack.c.bf16 %v5196_v46, %v5196_v46  ;;  %v5207_v0 = vsub.f32 %v572_v53, %v5196_v46 }
 0x6c1   : > { %5266 = vst.msk [vmem:[%s9120_s17 + $0x18] sm:$0xf] %vm5265_vm1, %v6020_v47  ;;  %v5214_v28 = vmul.f32 %v5207_v0, %v5207_v0 }
 0x6c3   : > { %v5220_v11 = vsel %vm1795_vm0, %v5214_v28, 0.0 }
 0x6f8   : > { %v5114_v55 = vpop.f32.mrb[20].mxu1 }
 0x6f9   : > { %v6097_v56 = vadd.f32 %v5114_v55, %v3707_v51  ;;  %v5116_v59 = vpop.f32.mrb[21].mxu1 }
 0x6fa   : > { %v6098_v60 = vadd.f32 %v5116_v59, %v3711_v52  ;;  %v5118_v61 = vpop.f32.mrb[22].mxu1 }
 0x6fb   : > { %v5205_v4 = vsub.f32 %v570_v54, %v6097_v56  ;;  %v5119_v6 = vpop.f32.mrb[23].mxu1 }
 0x6fc   : > { %v5206_v7 = vsub.f32 %v571_v57, %v6098_v60  ;;  %v6019_v8 = vpack.c.bf16 %v6098_v60, %v6097_v56 }
 0x6fd   : > { %v5212_v62 = vmul.f32 %v5205_v4, %v5205_v4 }
 0x6fe   : > { %v5213_v5 = vmul.f32 %v5206_v7, %v5206_v7  ;;  %5264 = vst [vmem:[%s9120_s17 + $0x10] sm:$0xff] %v6019_v8  ;;  %s7040_s17 = sshll.u32 %s7101_s21, 4  ;;  %s7041_s17 = int_to_ptr.vmem [resolvable:$false] %s7040_s17 }
 0x6ff   : > { %v5218_v9 = vadd.f32 %v5217_v35, %v5212_v62  ;;  %s7042_s1 = scalar_lea.vmem %s7041_s17, 256  ;;  %p7043_p0 = scmp.lt.s32.totalorder %s5297_s26, %s7041_s17 }
 0x700   : > { %p7044_p1 = scmp.lt.s32.totalorder %s7042_s1, %s7036_s28 }
 0x701   : > { %v5219_v10 = vadd.f32 %v5218_v9, %v5213_v5 }
 0x702   : > { %p7045_p2 = por %p7044_p1, %p7043_p0 }
 0x703   : > { %v5221_v13 = vadd.f32 %v5220_v11, %v5219_v10 }
 0x704   : > { %p7046_p3 = pnand %p7045_p2, %p7039_p13 }
 0x705   : > { %5222 = vadd.xlane.f32.xlu0 %v5221_v13 }
 0x706   : > { %7049 = shalt.err (!%p7046_p3)
}
 0x707   : > { %s7050_s25 = scalar_lea.hbm %s9140_s29, 128  ;;  %s7054_s30 = scalar_lea.hbm %s9198_s16, 384 }
 0x708   : > { %p7051_p4 = scmp.ne.s32.totalorder %s9140_s29, %s7050_s25  ;;  %p7055_p9 = scmp.lt.u32.totalorder %s9140_s29, %s9198_s16 }
 0x709   : > { %p7056_p10 = scmp.lt.u32.totalorder %s7054_s30, %s7050_s25  ;;  %p7058_p12 = scmp.lt.u32.totalorder %s7050_s25, %s9140_s29 }
 0x70a   : > { %p7052_p7 = pnand %p7051_p4, %p7225_p5 }
 0x70b   : > { %p7057_p11 = por %p7056_p10, %p7055_p9 }
 0x70c   : > { %p7053_p8 = pneg %p7052_p7 }
 0x70d   : > { %p7059_p13 = por %p7058_p12, %p7057_p11 }
 0x70f   : > { %p7060_p0 = pnand %p7059_p13, %p7053_p8 }
 0x711   : > { %7063 = shalt.err (!%p7060_p0)
}
 0x712   : > { %6143 = dma.vmem_to_hbm [thread:$0]  (%p7225_p5), %s5297_s26, 128, %s9140_s29, %s5277_s19  }
 0x713   : > { %s9222_s28 = sld [smem:[#allocation13_spill]] }
 0x719   : > { %s555_s21 = scalar_lea.vmem %s9222_s28, %s7345_s20 }
 0x792   : > { %v5223_v16 = vpop.xlane.xlu0 %5222 }
 0x793   : > { %v5224_v12 = vrot.slane %v5223_v16, 4 }
 0x795   : > { %v5225_v15 = vadd.f32 %v5224_v12, %v5223_v16 }
 0x797   : > { %v5226_v18 = vrot.slane %v5225_v15, 2 }
 0x799   : > { %v5227_v20 = vadd.f32 %v5226_v18, %v5225_v15 }
 0x79b   : > { %v5228_v21 = vrot.slane %v5227_v20, 1 }
 0x79d   : > { %v5229_v22 = vadd.f32 %v5228_v21, %v5227_v20 }
 0x79f   : > { %6141 = vpush %v5229_v22 }
 0x7d0   : > { %s6142_s17 = spop %6141 }
 0x7d1   : > { %v5231_v63 = vstv %s6142_s17 }
 0x7d2   : > { %5232 = vst [vmem:[%s555_s21] sm:$0x1] %v5231_v63 }
 0x7d3 PF: > { %s9223_s0 = sld [smem:[#allocation7_spill]]  ;;  %s9224_s25 = sld [smem:[#allocation5_spill]] }
 0x7d9   : > { %p6149_p5 = scmp.ge.s32.totalorder %s9223_s0, 2  ;;  %s5322_s26 = sand.u32 1, %s9224_s25  }
 0x7da   : > { %s5323_s29 = scalar_lea.sflag [#allocation3], %s5322_s26 }
 0x7db   : > { %p6146_p1 = pnand %p6149_p5, %p7229_p6 }
 0x7dd   : > { %7081 = dma.done.wait (!%p6146_p1), %s5323_s29, 128  }
 0x7de   : > { %7083 = vsyncadd (!%p6146_p1), %s5323_s29, 4294967168  ;;  %s9226_s24 = sld [smem:[#allocation8_spill]]  ;;  %s9227_s19 = sld [smem:[#allocation6_spill]] }
 0x7df   : > { %s9228_s23 = sld [smem:[#allocation9_spill]]  ;;  %s9229_s21 = smov %s7090_s22 }
 0x7e4   : > { %p27_p2 = scmp.ge.s32.totalorder %s9226_s24, 5   ;;  %s9230_s22 = smov %s9227_s19 }
 0x7e6   :  { %29 = sbr.rel (!%p27_p2) target bundleno = 7 (0x7), region = 138 }
 0x7ed   :  { %5328 = vsyncpa [#allocation3], 1 }
 0x7ee   :  { %5330 = vsyncpa [#allocation3 + $0x1], 1 }

</bundles_post_ra>
